<compile_context>
chip_gen: v7x
topology: tpu7x:2x2x1
jax: 0.10.0
libtpu: 0.0.40
codegen_flags: <defaults>
</compile_context>

<pallas_src>
import math
import functools

import jax
import jax.numpy as jnp
from jax.experimental import pallas as pl
from jax.experimental.pallas import tpu as pltpu

FEAT = 256    # stand-in for ResNet-50's 2048-d avgpool feature
HID  = 512    # stand-in for projection_hidden_size=4096
PROJ = 128    # stand-in for projection_size=1024
KH = KW = 7
STRIDE = 2
PAD = 3
BN_EPS = 1e-5

TF = 128      # FEAT (output-channel) tile -> "parallel" grid axis (v7x 2-TC / megacore)
TP = 128      # spatial-patch tile -> "arbitrary" (streamed/accumulated) axis.
              # Raise to 512-1024 for realistic (224x224, B>=32) sizes; 128 here so the
              # toy example exercises the multi-step accumulation path.


def conv_gap_kernel(patch_ref, cw_ref, rep_ref, acc_ref, *, inv_p):
    """One (feat-block, patch-block) grid step: conv-as-matmul + ReLU + global-avg-pool.

    patch_ref: (B, tp, Kpad) bf16  im2col patches for tp spatial positions (all batches)
    cw_ref:    (Kpad, TF)    bf16  flattened conv weight slab for TF output channels
    rep_ref:   (B, TF)       f32   GAP features (written only on last patch block)
    acc_ref:   (B, TF)       f32   running GAP sum (VMEM scratch, persists across p steps)
    """
    p = pl.program_id(1)

    @pl.when(p == 0)
    def _():
        acc_ref[...] = jnp.zeros_like(acc_ref)

    b, tp, kpad = patch_ref.shape
    # Single 2-D bf16 matmul (keeps cw weight-stationary, full MXU row occupancy),
    # f32 accumulation on the MXU.
    x = patch_ref[...].reshape(b * tp, kpad)
    y = jnp.dot(x, cw_ref[...], preferred_element_type=jnp.float32)   # (B*tp, TF) f32
    y = jnp.maximum(y, 0.0)                                           # ReLU
    acc_ref[...] += y.reshape(b, tp, -1).sum(axis=1)                  # partial GAP sums

    @pl.when(p == pl.num_programs(1) - 1)
    def _():
        rep_ref[...] = acc_ref[...] * inv_p                           # mean over the true P


def projector_kernel(rep_ref, w1_ref, b1_ref, g_ref, be_ref, w2_ref, b2_ref, proj_ref):
    """BYOL projector: Linear -> BatchNorm1d (batch stats, train mode) -> ReLU -> Linear.
    Negligible FLOPs vs. the conv path -> single grid point, whole arrays in VMEM."""
    rep = rep_ref[...]                                                 # (B, FEAT) f32
    h = jnp.dot(rep.astype(jnp.bfloat16), w1_ref[...],
                preferred_element_type=jnp.float32) + b1_ref[...]      # (B, HID)
    mu = jnp.mean(h, axis=0, keepdims=True)
    var = jnp.mean((h - mu) ** 2, axis=0, keepdims=True)               # biased var (PyTorch BN)
    hn = (h - mu) * jax.lax.rsqrt(var + BN_EPS)
    hn = hn * g_ref[...] + be_ref[...]
    hn = jnp.maximum(hn, 0.0)
    proj_ref[...] = jnp.dot(hn.astype(jnp.bfloat16), w2_ref[...],
                            preferred_element_type=jnp.float32) + b2_ref[...]


def init_params(key, in_ch=3):
    ks = jax.random.split(key, 4)
    k_conv = in_ch * KH * KW
    return {
        'conv_w': jax.random.normal(ks[0], (FEAT, in_ch, KH, KW), jnp.float32)
                  * (1.0 / math.sqrt(k_conv)),
        'w1':     jax.random.normal(ks[1], (FEAT, HID), jnp.float32) * (1.0 / math.sqrt(FEAT)),
        'b1':     jnp.zeros((1, HID), jnp.float32),
        'gamma':  jnp.ones((1, HID), jnp.float32),
        'beta':   jnp.zeros((1, HID), jnp.float32),
        'w2':     jax.random.normal(ks[2], (HID, PROJ), jnp.float32) * (1.0 / math.sqrt(HID)),
        'b2':     jax.random.normal(ks[3], (1, PROJ), jnp.float32) * 0.01,
    }


def byol_forward(x_nchw, params):
    """x_nchw: (B, C, H, W) float32 -> (projection (B, PROJ), representation (B, FEAT))."""
    B, C, H, W = x_nchw.shape
    OH = (H + 2 * PAD - KH) // STRIDE + 1
    OW = (W + 2 * PAD - KW) // STRIDE + 1
    P = OH * OW
    K = C * KH * KW
    Kpad = ((K + 127) // 128) * 128                  # lane-align contraction dim (147 -> 256)
    tp = min(TP, P)
    P_pad = ((P + tp - 1) // tp) * tp

    # im2col emitted directly in (B, OH, OW, K) order (channel-major K) -> no materialized
    # HBM round-trip transpose of the large patch tensor.
    patches = jax.lax.conv_general_dilated_patches(
        x_nchw, (KH, KW), (STRIDE, STRIDE), ((PAD, PAD), (PAD, PAD)),
        dimension_numbers=('NCHW', 'OIHW', 'NHWC'))
    patches = patches.reshape(B, P, K)
    # Zero-pad K to a lane multiple and P to a tile multiple. Exact: the stand-in conv has no
    # bias, ReLU(0)=0, and the mean divides by the true P (zero rows contribute nothing).
    patches = jnp.pad(patches, ((0, 0), (0, P_pad - P), (0, Kpad - K))).astype(jnp.bfloat16)

    # Flatten conv weight (out, in, kh, kw) -> (K, FEAT), channel-major to match patch order;
    # pad K side with zeros (both operands padded -> numerically identical).
    cw = params['conv_w'].reshape(FEAT, K).T
    cw = jnp.pad(cw, ((0, Kpad - K), (0, 0))).astype(jnp.bfloat16)

    w1 = params['w1'].astype(jnp.bfloat16)
    w2 = params['w2'].astype(jnp.bfloat16)

    # ---- Kernel 1: conv-as-matmul + ReLU + GAP; FEAT-parallel x P-streamed (double-buffered) ----
    rep = pl.pallas_call(
        functools.partial(conv_gap_kernel, inv_p=1.0 / float(P)),
        out_shape=jax.ShapeDtypeStruct((B, FEAT), jnp.float32),
        grid_spec=pltpu.PrefetchScalarGridSpec(
            num_scalar_prefetch=0,
            grid=(FEAT // TF, P_pad // tp),
            in_specs=[
                pl.BlockSpec((B, tp, Kpad), lambda f, p: (0, p, 0)),
                pl.BlockSpec((Kpad, TF),    lambda f, p: (0, f)),
            ],
            out_specs=pl.BlockSpec((B, TF), lambda f, p: (0, f)),
            scratch_shapes=[pltpu.VMEM((B, TF), jnp.float32)]),
        compiler_params=pltpu.CompilerParams(
            dimension_semantics=("parallel", "arbitrary"),
            vmem_limit_bytes=32 * 1024 * 1024),
    )(patches, cw)

    # ---- Kernel 2: projector MLP (tiny; whole arrays in VMEM, single grid point) ----
    vmem = pl.BlockSpec(memory_space=pltpu.MemorySpace.VMEM)
    proj = pl.pallas_call(
        projector_kernel,
        out_shape=jax.ShapeDtypeStruct((B, PROJ), jnp.float32),
        in_specs=[vmem] * 7,
        out_specs=vmem,
    )(rep, w1, params['b1'], params['gamma'], params['beta'], w2, params['b2'])

    return proj, rep


if __name__ == "__main__":
    key = jax.random.PRNGKey(0)
    kx, kp = jax.random.split(key)
    x = jax.random.normal(kx, (2, 3, 32, 32), jnp.float32)   # small NCHW image batch
    params = init_params(kp, in_ch=3)

    projection, representation = jax.jit(byol_forward)(x, params)
    jax.block_until_ready((projection, representation))

    assert projection.shape == (2, PROJ) and projection.dtype == jnp.float32
    assert representation.shape == (2, FEAT) and representation.dtype == jnp.float32
    assert bool(jnp.all(jnp.isfinite(projection))) and bool(jnp.all(jnp.isfinite(representation)))
    print("KERNEL_OK")
</pallas_src>

<mosaic_0001>
module attributes {stable_mosaic.version = 11 : i64} {
  func.func @conv_gap_kernel(%arg0: i32, %arg1: i32, %arg2: memref<2x128x256xbf16, #tpu.memory_space<vmem>>, %arg3: memref<256x128xbf16, #tpu.memory_space<vmem>>, %arg4: memref<2x128xf32, #tpu.memory_space<vmem>>, %arg5: memref<2x128xf32, #tpu.memory_space<vmem>>) attributes {dimension_semantics = [#tpu.dimension_semantics<parallel>, #tpu.dimension_semantics<arbitrary>], iteration_bounds = array<i64: 2, 2>, scalar_prefetch = 0 : i64, scratch_operands = 1 : i64, tpu.core_type = #tpu.core_type<tc>, window_params = [{transform_indices = @transform_0, window_bounds = array<i64: 2, 128, 256>}, {transform_indices = @transform_1, window_bounds = array<i64: 256, 128>}, {transform_indices = @transform_2, window_bounds = array<i64: 2, 128>}]} {
    %c0_i32 = arith.constant 0 : i32
    %0 = arith.cmpi eq, %arg1, %c0_i32 : i32
    %1 = arith.extui %0 : i1 to i32
    %c0_i32_0 = arith.constant 0 : i32
    %2 = arith.cmpi ne, %1, %c0_i32_0 : i32
    scf.if %2 {
      %cst_12 = arith.constant 0.000000e+00 : f32
      %17 = vector.broadcast %cst_12 : f32 to vector<2x128xf32>
      %c0_13 = arith.constant 0 : index
      %c0_14 = arith.constant 0 : index
      %18 = vector.load %arg5[%c0_13, %c0_14] : memref<2x128xf32, #tpu.memory_space<vmem>>, vector<2x128xf32>
      tpu.vector_store %arg5[%c0_13, %c0_14], %17 {strides = array<i32>} : memref<2x128xf32, #tpu.memory_space<vmem>>, vector<2x128xf32>,
    } else {
    }
    %c0 = arith.constant 0 : index
    %c0_1 = arith.constant 0 : index
    %c0_2 = arith.constant 0 : index
    %3 = vector.load %arg2[%c0, %c0_1, %c0_2] : memref<2x128x256xbf16, #tpu.memory_space<vmem>>, vector<2x128x256xbf16>
    %4 = vector.shape_cast %3 : vector<2x128x256xbf16> to vector<256x256xbf16>
    %c0_3 = arith.constant 0 : index
    %c0_4 = arith.constant 0 : index
    %5 = vector.load %arg3[%c0_3, %c0_4] : memref<256x128xbf16, #tpu.memory_space<vmem>>, vector<256x128xbf16>
    %cst = arith.constant dense<0.000000e+00> : vector<256x128xf32>
    %6 = tpu.matmul %4, %5, %cst {dimension_numbers = #tpu.dot_dimension_numbers<[1], [0], [0], [1], [0, 0, 1, 1], [], []>} : vector<256x256xbf16>, vector<256x128xbf16>, vector<256x128xf32> -> vector<256x128xf32>
    %cst_5 = arith.constant 0.000000e+00 : f32
    %7 = vector.broadcast %cst_5 : f32 to vector<256x128xf32>
    %8 = arith.maximumf %6, %7 : vector<256x128xf32>
    %c0_6 = arith.constant 0 : index
    %c0_7 = arith.constant 0 : index
    %9 = vector.load %arg5[%c0_6, %c0_7] : memref<2x128xf32, #tpu.memory_space<vmem>>, vector<2x128xf32>
    %10 = vector.shape_cast %8 : vector<256x128xf32> to vector<2x128x128xf32>
    %cst_8 = arith.constant dense<0.000000e+00> : vector<2x128xf32>
    %11 = vector.multi_reduction <add>, %10, %cst_8 [1] : vector<2x128x128xf32> to vector<2x128xf32>
    %12 = arith.addf %9, %11 : vector<2x128xf32>
    %c0_9 = arith.constant 0 : index
    %c0_10 = arith.constant 0 : index
    %13 = vector.load %arg5[%c0_9, %c0_10] : memref<2x128xf32, #tpu.memory_space<vmem>>, vector<2x128xf32>
    tpu.vector_store %arg5[%c0_9, %c0_10], %12 {strides = array<i32>} : memref<2x128xf32, #tpu.memory_space<vmem>>, vector<2x128xf32>,
    %c1_i32 = arith.constant 1 : i32
    %14 = arith.cmpi eq, %arg1, %c1_i32 : i32
    %15 = arith.extui %14 : i1 to i32
    %c0_i32_11 = arith.constant 0 : i32
    %16 = arith.cmpi ne, %15, %c0_i32_11 : i32
    scf.if %16 {
      %c0_12 = arith.constant 0 : index
      %c0_13 = arith.constant 0 : index
      %17 = vector.load %arg5[%c0_12, %c0_13] : memref<2x128xf32, #tpu.memory_space<vmem>>, vector<2x128xf32>
      %cst_14 = arith.constant 3.906250e-03 : f32
      %18 = vector.broadcast %cst_14 : f32 to vector<2x128xf32>
      %19 = arith.mulf %17, %18 : vector<2x128xf32>
      %c0_15 = arith.constant 0 : index
      %c0_16 = arith.constant 0 : index
      %20 = vector.load %arg4[%c0_15, %c0_16] : memref<2x128xf32, #tpu.memory_space<vmem>>, vector<2x128xf32>
      tpu.vector_store %arg4[%c0_15, %c0_16], %19 {strides = array<i32>} : memref<2x128xf32, #tpu.memory_space<vmem>>, vector<2x128xf32>,
    } else {
    }
    return
  }
  func.func @transform_0(%arg0: i32, %arg1: i32) -> (i32, i32, i32) {
    %c0_i32 = arith.constant 0 : i32
    %c0_i32_0 = arith.constant 0 : i32
    %c0_i32_1 = arith.constant 0 : i32
    return %c0_i32, %arg1, %c0_i32_0 : i32, i32, i32
  }
  func.func @transform_1(%arg0: i32, %arg1: i32) -> (i32, i32) {
    %c0_i32 = arith.constant 0 : i32
    %c0_i32_0 = arith.constant 0 : i32
    return %c0_i32, %arg0 : i32, i32
  }
  func.func @transform_2(%arg0: i32, %arg1: i32) -> (i32, i32) {
    %c0_i32 = arith.constant 0 : i32
    %c0_i32_0 = arith.constant 0 : i32
    return %c0_i32, %arg0 : i32, i32
  }
}

module attributes {stable_mosaic.version = 11 : i64} {
  func.func @projector_kernel(%arg0: memref<2x256xf32, #tpu.memory_space<vmem>>, %arg1: memref<256x512xbf16, #tpu.memory_space<vmem>>, %arg2: memref<1x512xf32, #tpu.memory_space<vmem>>, %arg3: memref<1x512xf32, #tpu.memory_space<vmem>>, %arg4: memref<1x512xf32, #tpu.memory_space<vmem>>, %arg5: memref<512x128xbf16, #tpu.memory_space<vmem>>, %arg6: memref<1x128xf32, #tpu.memory_space<vmem>>, %arg7: memref<2x128xf32, #tpu.memory_space<vmem>>) attributes {dimension_semantics = [], scalar_prefetch = 0 : i64, scratch_operands = 0 : i64, tpu.core_type = #tpu.core_type<tc>} {
    %c0 = arith.constant 0 : index
    %c0_0 = arith.constant 0 : index
    %0 = vector.load %arg0[%c0, %c0_0] : memref<2x256xf32, #tpu.memory_space<vmem>>, vector<2x256xf32>
    %1 = arith.truncf %0 : vector<2x256xf32> to vector<2x256xbf16>
    %c0_1 = arith.constant 0 : index
    %c0_2 = arith.constant 0 : index
    %2 = vector.load %arg1[%c0_1, %c0_2] : memref<256x512xbf16, #tpu.memory_space<vmem>>, vector<256x512xbf16>
    %cst = arith.constant dense<0.000000e+00> : vector<2x512xf32>
    %3 = tpu.matmul %1, %2, %cst {dimension_numbers = #tpu.dot_dimension_numbers<[1], [0], [0], [1], [0, 0, 1, 1], [], []>} : vector<2x256xbf16>, vector<256x512xbf16>, vector<2x512xf32> -> vector<2x512xf32>
    %c0_3 = arith.constant 0 : index
    %c0_4 = arith.constant 0 : index
    %4 = vector.load %arg2[%c0_3, %c0_4] : memref<1x512xf32, #tpu.memory_space<vmem>>, vector<1x512xf32>
    %5 = vector.broadcast %4 : vector<1x512xf32> to vector<2x512xf32>
    %6 = arith.addf %3, %5 : vector<2x512xf32>
    %cst_5 = arith.constant dense<0.000000e+00> : vector<512xf32>
    %7 = vector.multi_reduction <add>, %6, %cst_5 [0] : vector<2x512xf32> to vector<512xf32>
    %8 = vector.shape_cast %7 : vector<512xf32> to vector<1x512xf32>
    %cst_6 = arith.constant 2.000000e+00 : f32
    %9 = vector.broadcast %cst_6 : f32 to vector<1x512xf32>
    %10 = arith.divf %8, %9 : vector<1x512xf32>
    %11 = vector.broadcast %10 : vector<1x512xf32> to vector<2x512xf32>
    %12 = arith.subf %6, %11 : vector<2x512xf32>
    %13 = arith.mulf %12, %12 : vector<2x512xf32>
    %cst_7 = arith.constant dense<0.000000e+00> : vector<512xf32>
    %14 = vector.multi_reduction <add>, %13, %cst_7 [0] : vector<2x512xf32> to vector<512xf32>
    %15 = vector.shape_cast %14 : vector<512xf32> to vector<1x512xf32>
    %cst_8 = arith.constant 2.000000e+00 : f32
    %16 = vector.broadcast %cst_8 : f32 to vector<1x512xf32>
    %17 = arith.divf %15, %16 : vector<1x512xf32>
    %18 = vector.broadcast %10 : vector<1x512xf32> to vector<2x512xf32>
    %19 = arith.subf %6, %18 : vector<2x512xf32>
    %cst_9 = arith.constant 9.99999974E-6 : f32
    %20 = vector.broadcast %cst_9 : f32 to vector<1x512xf32>
    %21 = arith.addf %17, %20 : vector<1x512xf32>
    %22 = math.rsqrt %21 : vector<1x512xf32>
    %23 = vector.broadcast %22 : vector<1x512xf32> to vector<2x512xf32>
    %24 = arith.mulf %19, %23 : vector<2x512xf32>
    %c0_10 = arith.constant 0 : index
    %c0_11 = arith.constant 0 : index
    %25 = vector.load %arg3[%c0_10, %c0_11] : memref<1x512xf32, #tpu.memory_space<vmem>>, vector<1x512xf32>
    %26 = vector.broadcast %25 : vector<1x512xf32> to vector<2x512xf32>
    %27 = arith.mulf %24, %26 : vector<2x512xf32>
    %c0_12 = arith.constant 0 : index
    %c0_13 = arith.constant 0 : index
    %28 = vector.load %arg4[%c0_12, %c0_13] : memref<1x512xf32, #tpu.memory_space<vmem>>, vector<1x512xf32>
    %29 = vector.broadcast %28 : vector<1x512xf32> to vector<2x512xf32>
    %30 = arith.addf %27, %29 : vector<2x512xf32>
    %cst_14 = arith.constant 0.000000e+00 : f32
    %31 = vector.broadcast %cst_14 : f32 to vector<2x512xf32>
    %32 = arith.maximumf %30, %31 : vector<2x512xf32>
    %33 = arith.truncf %32 : vector<2x512xf32> to vector<2x512xbf16>
    %c0_15 = arith.constant 0 : index
    %c0_16 = arith.constant 0 : index
    %34 = vector.load %arg5[%c0_15, %c0_16] : memref<512x128xbf16, #tpu.memory_space<vmem>>, vector<512x128xbf16>
    %cst_17 = arith.constant dense<0.000000e+00> : vector<2x128xf32>
    %35 = tpu.matmul %33, %34, %cst_17 {dimension_numbers = #tpu.dot_dimension_numbers<[1], [0], [0], [1], [0, 0, 1, 1], [], []>} : vector<2x512xbf16>, vector<512x128xbf16>, vector<2x128xf32> -> vector<2x128xf32>
    %c0_18 = arith.constant 0 : index
    %c0_19 = arith.constant 0 : index
    %36 = vector.load %arg6[%c0_18, %c0_19] : memref<1x128xf32, #tpu.memory_space<vmem>>, vector<1x128xf32>
    %37 = vector.broadcast %36 : vector<1x128xf32> to vector<2x128xf32>
    %38 = arith.addf %35, %37 : vector<2x128xf32>
    %c0_20 = arith.constant 0 : index
    %c0_21 = arith.constant 0 : index
    %39 = vector.load %arg7[%c0_20, %c0_21] : memref<2x128xf32, #tpu.memory_space<vmem>>, vector<2x128xf32>
    tpu.vector_store %arg7[%c0_20, %c0_21], %38 {strides = array<i32>} : memref<2x128xf32, #tpu.memory_space<vmem>>, vector<2x128xf32>,
    return
  }
}

</mosaic_0001>

<bundles_post_ra>
// kernel: byol_forward.2
= control target key start
LH: loop header
LB: loop body
LE: loop exit
PB: predicated region body
PF: predicated region fallthrough
CT: control target
= control target key end

     0   :  { %s1585_s9 = smov 0   ;;  %s1587_s10 = smov 0   ;;  %s1900_s0 = inlined_call_operand.vmem [shape: bf16[2,256,256], index: 0, kind: input, shape index: {}]   ;;  %s1901_s1 = inlined_call_operand.vmem [shape: bf16[256,256], index: 1, kind: input, shape index: {}]   ;;  %s1902_s2 = inlined_call_operand.vmem [shape: f32[2,256], index: 2, kind: output, shape index: {}]  }
   0x1   :  { %s1589_s11 = smov 0   ;;  %s1591_s12 = smov 0  }
   0x2   :  { %s1593_s13 = smov 0   ;;  %s1595_s14 = smov 0  }
   0x3   :  { %s1597_s15 = smov 0   ;;  %s1599_s16 = smov 0  }
   0x4   :  { %s1601_s17 = smov 0  }
   0x5 LB: > { %s21_s18 = sadd.s32 1, %s1559_s15  ;;  %s24_s19 = sadd.s32 1, %s1563_s16  ;;  %s1567_s17 = sphi %s1601_s17, %s12_s17   ;;  %s1563_s16 = sphi %s1599_s16, %s1911_s16   ;;  %s1559_s15 = sphi %s1597_s15, %s1910_s15   ;;  %s1555_s14 = sphi %s1595_s14, %s1909_s14   ;;  %s1551_s13 = sphi %s1593_s13, %s1908_s13   ;;  %s1547_s12 = sphi %s1591_s12, %s1907_s12   ;;  %s1543_s11 = sphi %s1589_s11, %s1906_s11   ;;  %s1539_s10 = sphi %s1587_s10, %s1905_s10   ;;  %s1535_s9 = sphi %s1585_s9, %s1904_s9  }
   0x6   : > { %p22_p0 = scmp.ge.s32.totalorder %s21_s18, 2  ;;  %s31_s20 = sadd.s32 1, %s1547_s12 }
   0x7   : > { %p38_p1 = scmp.ne.s32.totalorder %s1547_s12, %s1543_s11  ;;  %p39_p2 = scmp.eq.s32.totalorder %s1567_s17, 0 }
   0x8   : > { %s1913_s18 = smov (%p22_p0, %s21_s18), 0  ;;  %s1915_s19 = smov (!%p22_p0, %s24_s19), %s1563_s16 }
   0x9   : > { %s28_s21 = ssub.s32 %s1559_s15, %s1913_s18  ;;  %p40_p3 = por %p39_p2, %p38_p1 }
   0xa   : > { %p26_p4 = scmp.ge.s32.totalorder %s1915_s19, 2  ;;  %p29_p5 = scmp.eq.s32.totalorder %s28_s21, 0 }
   0xb   : > { %s57_s22 = sadd.s32 1, %s1539_s10  ;;  %p64_p6 = scmp.ne.s32.totalorder %s1539_s10, %s1535_s9 }
   0xc   : > { %s1917_s19 = smov (%p26_p4, %s1915_s19), 0  ;;  %p1167_p9 = scmp.ge.s32.totalorder %s1567_s17, 4 }
   0xd   : > { %s1647_s23 = scalar_select %p29_p5, %s1547_s12, %s31_s20  }
   0xe   : > { %s54_s24 = ssub.s32 %s1563_s16, %s1917_s19  ;;  %p1651_p7 = por %p64_p6, %p39_p2 }
   0xf   : > { %p55_p8 = scmp.eq.s32.totalorder %s54_s24, 0  ;;  %116 = sbr.rel (%p1167_p9) target bundleno = 67 (0x43), region = 16 }
  0x11   : > { %s1656_s26 = scalar_select %p55_p8, %s1539_s10, %s57_s22  }
  0x16   : > { %119 = sbr.rel (!%p40_p3) target bundleno = 42 (0x2a), region = 20  ;;  %s121_s27 = sand.u32 (%p40_p3), 1, %s1547_s12  }
  0x17   : > { %s1231_s28 = sshll.u32 (%p40_p3), %s1559_s15, 7  ;;  %s1168_s29 = sshll.u32 (%p40_p3), %s121_s27, 8 }
  0x18   : > { %s1664_s4 = scalar_lea.vmem (%p40_p3), %s1900_s0, %s1231_s28  ;;  %s1669_s5 = scalar_lea.vmem (%p40_p3), [#allocation3], %s1168_s29 }
  0x19   : > { %v217_v0 = vld [vmem:[%s1664_s4] sm:$0xff] (%p40_p3)  ;;  %v219_v1 = vld [vmem:[%s1664_s4 + $0x8] sm:$0xff] (%p40_p3)  ;;  %v221_v2 = vld [vmem:[%s1664_s4 + $0x10] sm:$0xff] (%p40_p3) }
  0x1a   : > { %218 = vst [vmem:[%s1669_s5] sm:$0xff] (%p40_p3), %v217_v0  ;;  %220 = vst [vmem:[%s1669_s5 + $0x8] sm:$0xff] (%p40_p3), %v219_v1  ;;  %v223_v3 = vld [vmem:[%s1664_s4 + $0x18] sm:$0xff] (%p40_p3)  ;;  %v225_v4 = vld [vmem:[%s1664_s4 + $0x20] sm:$0xff] (%p40_p3) }
  0x1b   : > { %222 = vst [vmem:[%s1669_s5 + $0x10] sm:$0xff] (%p40_p3), %v221_v2  ;;  %v227_v5 = vld [vmem:[%s1664_s4 + $0x28] sm:$0xff] (%p40_p3)  ;;  %224 = vst [vmem:[%s1669_s5 + $0x18] sm:$0xff] (%p40_p3), %v223_v3  ;;  %v229_v6 = vld [vmem:[%s1664_s4 + $0x30] sm:$0xff] (%p40_p3) }
  0x1c   : > { %226 = vst [vmem:[%s1669_s5 + $0x20] sm:$0xff] (%p40_p3), %v225_v4  ;;  %228 = vst [vmem:[%s1669_s5 + $0x28] sm:$0xff] (%p40_p3), %v227_v5  ;;  %v231_v7 = vld [vmem:[%s1664_s4 + $0x38] sm:$0xff] (%p40_p3)  ;;  %v233_v8 = vld [vmem:[%s1664_s4 + $0x40] sm:$0xff] (%p40_p3) }
  0x1d   : > { %230 = vst [vmem:[%s1669_s5 + $0x30] sm:$0xff] %v229_v6  ;;  %232 = vst [vmem:[%s1669_s5 + $0x38] sm:$0xff] %v231_v7  ;;  %v235_v9 = vld [vmem:[%s1664_s4 + $0x48] sm:$0xff]  ;;  %v237_v10 = vld [vmem:[%s1664_s4 + $0x50] sm:$0xff] }
  0x1e   : > { %234 = vst [vmem:[%s1669_s5 + $0x40] sm:$0xff] %v233_v8  ;;  %v239_v11 = vld [vmem:[%s1664_s4 + $0x58] sm:$0xff]  ;;  %236 = vst [vmem:[%s1669_s5 + $0x48] sm:$0xff] %v235_v9  ;;  %v241_v12 = vld [vmem:[%s1664_s4 + $0x60] sm:$0xff] }
  0x1f   : > { %238 = vst [vmem:[%s1669_s5 + $0x50] sm:$0xff] %v237_v10  ;;  %240 = vst [vmem:[%s1669_s5 + $0x58] sm:$0xff] %v239_v11  ;;  %v243_v13 = vld [vmem:[%s1664_s4 + $0x68] sm:$0xff]  ;;  %v245_v14 = vld [vmem:[%s1664_s4 + $0x70] sm:$0xff] }
  0x20   : > { %242 = vst [vmem:[%s1669_s5 + $0x60] sm:$0xff] %v241_v12  ;;  %244 = vst [vmem:[%s1669_s5 + $0x68] sm:$0xff] %v243_v13  ;;  %v247_v15 = vld [vmem:[%s1664_s4 + $0x78] sm:$0xff]  ;;  %v249_v16 = vld [vmem:[%s1664_s4 + $0x100] sm:$0xff] }
  0x21   : > { %246 = vst [vmem:[%s1669_s5 + $0x70] sm:$0xff] %v245_v14  ;;  %v251_v17 = vld [vmem:[%s1664_s4 + $0x108] sm:$0xff]  ;;  %248 = vst [vmem:[%s1669_s5 + $0x78] sm:$0xff] %v247_v15  ;;  %v253_v18 = vld [vmem:[%s1664_s4 + $0x110] sm:$0xff] }
  0x22   : > { %250 = vst [vmem:[%s1669_s5 + $0x80] sm:$0xff] %v249_v16  ;;  %252 = vst [vmem:[%s1669_s5 + $0x88] sm:$0xff] %v251_v17  ;;  %v255_v19 = vld [vmem:[%s1664_s4 + $0x118] sm:$0xff]  ;;  %v257_v20 = vld [vmem:[%s1664_s4 + $0x120] sm:$0xff] }
  0x23   : > { %254 = vst [vmem:[%s1669_s5 + $0x90] sm:$0xff] %v253_v18  ;;  %256 = vst [vmem:[%s1669_s5 + $0x98] sm:$0xff] %v255_v19  ;;  %v259_v21 = vld [vmem:[%s1664_s4 + $0x128] sm:$0xff]  ;;  %v261_v22 = vld [vmem:[%s1664_s4 + $0x130] sm:$0xff] }
  0x24   : > { %258 = vst [vmem:[%s1669_s5 + $0xa0] sm:$0xff] %v257_v20  ;;  %v263_v23 = vld [vmem:[%s1664_s4 + $0x138] sm:$0xff]  ;;  %260 = vst [vmem:[%s1669_s5 + $0xa8] sm:$0xff] %v259_v21  ;;  %v265_v24 = vld [vmem:[%s1664_s4 + $0x140] sm:$0xff] }
  0x25   : > { %262 = vst [vmem:[%s1669_s5 + $0xb0] sm:$0xff] %v261_v22  ;;  %264 = vst [vmem:[%s1669_s5 + $0xb8] sm:$0xff] %v263_v23  ;;  %v267_v25 = vld [vmem:[%s1664_s4 + $0x148] sm:$0xff]  ;;  %v269_v26 = vld [vmem:[%s1664_s4 + $0x150] sm:$0xff] }
  0x26   : > { %266 = vst [vmem:[%s1669_s5 + $0xc0] sm:$0xff] %v265_v24  ;;  %268 = vst [vmem:[%s1669_s5 + $0xc8] sm:$0xff] %v267_v25  ;;  %v271_v27 = vld [vmem:[%s1664_s4 + $0x158] sm:$0xff]  ;;  %v273_v28 = vld [vmem:[%s1664_s4 + $0x160] sm:$0xff] }
  0x27   : > { %270 = vst [vmem:[%s1669_s5 + $0xd0] sm:$0xff] %v269_v26  ;;  %v275_v29 = vld [vmem:[%s1664_s4 + $0x168] sm:$0xff]  ;;  %272 = vst [vmem:[%s1669_s5 + $0xd8] sm:$0xff] %v271_v27  ;;  %v277_v30 = vld [vmem:[%s1664_s4 + $0x170] sm:$0xff] }
  0x28   : > { %274 = vst [vmem:[%s1669_s5 + $0xe0] sm:$0xff] %v273_v28  ;;  %276 = vst [vmem:[%s1669_s5 + $0xe8] sm:$0xff] %v275_v29  ;;  %v279_v31 = vld [vmem:[%s1664_s4 + $0x178] sm:$0xff] }
  0x29   : > { %278 = vst [vmem:[%s1669_s5 + $0xf0] sm:$0xff] %v277_v30  ;;  %280 = vst [vmem:[%s1669_s5 + $0xf8] sm:$0xff] %v279_v31 }
  0x2a PF: > { %286 = sbr.rel (!%p1651_p7) target bundleno = 67 (0x43), region = 58  ;;  %s288_s6 = sand.u32 (%p1651_p7), 1, %s1539_s10  }
  0x2b   : > { %s1173_s7 = sshll.u32 (%p1651_p7), %s1563_s16, 2  ;;  %s1172_s8 = sshll.u32 (%p1651_p7), %s288_s6, 7 }
  0x2c   : > { %s1739_s22 = scalar_lea.vmem (%p1651_p7), %s1901_s1, %s1173_s7  ;;  %s1743_s24 = scalar_lea.vmem (%p1651_p7), [#allocation4], %s1172_s8 }
  0x2d   : > { %v308_v32 = vld [vmem:[%s1739_s22] sm:$0xf] (%p1651_p7)  ;;  %v310_v33 = vld [vmem:[%s1739_s22 + $0x8] sm:$0xf] (%p1651_p7)  ;;  %v312_v34 = vld [vmem:[%s1739_s22 + $0x10] sm:$0xf] (%p1651_p7) }
  0x2e   : > { %309 = vst [vmem:[%s1743_s24] sm:$0xf] (%p1651_p7), %v308_v32  ;;  %311 = vst [vmem:[%s1743_s24 + $0x4] sm:$0xf] (%p1651_p7), %v310_v33  ;;  %v314_v35 = vld [vmem:[%s1739_s22 + $0x18] sm:$0xf] (%p1651_p7) }
  0x2f   : > { %v316_v36 = vld [vmem:[%s1739_s22 + $0x20] sm:$0xf] (%p1651_p7)  ;;  %313 = vst [vmem:[%s1743_s24 + $0x8] sm:$0xf] (%p1651_p7), %v312_v34  ;;  %315 = vst [vmem:[%s1743_s24 + $0xc] sm:$0xf] (%p1651_p7), %v314_v35 }
  0x30   : > { %317 = vst [vmem:[%s1743_s24 + $0x10] sm:$0xf] (%p1651_p7), %v316_v36  ;;  %v318_v37 = vld [vmem:[%s1739_s22 + $0x28] sm:$0xf] (%p1651_p7)  ;;  %v320_v38 = vld [vmem:[%s1739_s22 + $0x30] sm:$0xf] (%p1651_p7) }
  0x31   : > { %v322_v39 = vld [vmem:[%s1739_s22 + $0x38] sm:$0xf]  ;;  %319 = vst [vmem:[%s1743_s24 + $0x14] sm:$0xf] %v318_v37  ;;  %321 = vst [vmem:[%s1743_s24 + $0x18] sm:$0xf] %v320_v38 }
  0x32   : > { %323 = vst [vmem:[%s1743_s24 + $0x1c] sm:$0xf] %v322_v39  ;;  %v324_v40 = vld [vmem:[%s1739_s22 + $0x40] sm:$0xf]  ;;  %v326_v41 = vld [vmem:[%s1739_s22 + $0x48] sm:$0xf] }
  0x33   : > { %v328_v42 = vld [vmem:[%s1739_s22 + $0x50] sm:$0xf]  ;;  %325 = vst [vmem:[%s1743_s24 + $0x20] sm:$0xf] %v324_v40  ;;  %327 = vst [vmem:[%s1743_s24 + $0x24] sm:$0xf] %v326_v41 }
  0x34   : > { %329 = vst [vmem:[%s1743_s24 + $0x28] sm:$0xf] %v328_v42  ;;  %v330_v43 = vld [vmem:[%s1739_s22 + $0x58] sm:$0xf]  ;;  %v332_v44 = vld [vmem:[%s1739_s22 + $0x60] sm:$0xf] }
  0x35   : > { %v334_v45 = vld [vmem:[%s1739_s22 + $0x68] sm:$0xf]  ;;  %331 = vst [vmem:[%s1743_s24 + $0x2c] sm:$0xf] %v330_v43  ;;  %333 = vst [vmem:[%s1743_s24 + $0x30] sm:$0xf] %v332_v44 }
  0x36   : > { %335 = vst [vmem:[%s1743_s24 + $0x34] sm:$0xf] %v334_v45  ;;  %v336_v46 = vld [vmem:[%s1739_s22 + $0x70] sm:$0xf]  ;;  %v338_v47 = vld [vmem:[%s1739_s22 + $0x78] sm:$0xf] }
  0x37   : > { %v340_v48 = vld [vmem:[%s1739_s22 + $0x80] sm:$0xf]  ;;  %337 = vst [vmem:[%s1743_s24 + $0x38] sm:$0xf] %v336_v46  ;;  %339 = vst [vmem:[%s1743_s24 + $0x3c] sm:$0xf] %v338_v47 }
  0x38   : > { %341 = vst [vmem:[%s1743_s24 + $0x40] sm:$0xf] %v340_v48  ;;  %v342_v49 = vld [vmem:[%s1739_s22 + $0x88] sm:$0xf]  ;;  %v344_v50 = vld [vmem:[%s1739_s22 + $0x90] sm:$0xf] }
  0x39   : > { %v346_v51 = vld [vmem:[%s1739_s22 + $0x98] sm:$0xf]  ;;  %343 = vst [vmem:[%s1743_s24 + $0x44] sm:$0xf] %v342_v49  ;;  %345 = vst [vmem:[%s1743_s24 + $0x48] sm:$0xf] %v344_v50 }
  0x3a   : > { %347 = vst [vmem:[%s1743_s24 + $0x4c] sm:$0xf] %v346_v51  ;;  %v348_v52 = vld [vmem:[%s1739_s22 + $0xa0] sm:$0xf]  ;;  %v350_v53 = vld [vmem:[%s1739_s22 + $0xa8] sm:$0xf] }
  0x3b   : > { %v352_v54 = vld [vmem:[%s1739_s22 + $0xb0] sm:$0xf]  ;;  %349 = vst [vmem:[%s1743_s24 + $0x50] sm:$0xf] %v348_v52  ;;  %351 = vst [vmem:[%s1743_s24 + $0x54] sm:$0xf] %v350_v53 }
  0x3c   : > { %353 = vst [vmem:[%s1743_s24 + $0x58] sm:$0xf] %v352_v54  ;;  %v354_v55 = vld [vmem:[%s1739_s22 + $0xb8] sm:$0xf]  ;;  %v356_v56 = vld [vmem:[%s1739_s22 + $0xc0] sm:$0xf] }
  0x3d   : > { %v358_v57 = vld [vmem:[%s1739_s22 + $0xc8] sm:$0xf]  ;;  %355 = vst [vmem:[%s1743_s24 + $0x5c] sm:$0xf] %v354_v55  ;;  %357 = vst [vmem:[%s1743_s24 + $0x60] sm:$0xf] %v356_v56 }
  0x3e   : > { %359 = vst [vmem:[%s1743_s24 + $0x64] sm:$0xf] %v358_v57  ;;  %v360_v58 = vld [vmem:[%s1739_s22 + $0xd0] sm:$0xf]  ;;  %v362_v59 = vld [vmem:[%s1739_s22 + $0xd8] sm:$0xf] }
  0x3f   : > { %v364_v60 = vld [vmem:[%s1739_s22 + $0xe0] sm:$0xf]  ;;  %361 = vst [vmem:[%s1743_s24 + $0x68] sm:$0xf] %v360_v58  ;;  %363 = vst [vmem:[%s1743_s24 + $0x6c] sm:$0xf] %v362_v59 }
  0x40   : > { %365 = vst [vmem:[%s1743_s24 + $0x70] sm:$0xf] %v364_v60  ;;  %v366_v61 = vld [vmem:[%s1739_s22 + $0xe8] sm:$0xf]  ;;  %v368_v62 = vld [vmem:[%s1739_s22 + $0xf0] sm:$0xf] }
  0x41   : > { %v370_v63 = vld [vmem:[%s1739_s22 + $0xf8] sm:$0xf]  ;;  %367 = vst [vmem:[%s1743_s24 + $0x74] sm:$0xf] %v366_v61  ;;  %369 = vst [vmem:[%s1743_s24 + $0x78] sm:$0xf] %v368_v62 }
  0x42   : > { %371 = vst [vmem:[%s1743_s24 + $0x7c] sm:$0xf] %v370_v63 }
  0x43 PF: > { %p1174_p10 = scmp.ge.s32.totalorder %s1567_s17, 1  ;;  %p457_p11 = scmp.lt.s32.totalorder %s1567_s17, 5 }
  0x45   : > { %p458_p12 = pnand %p1174_p10, %p457_p11 }
  0x46   : > { %s464_s25 = sand.u32 (!%p458_p12), 1, %s1543_s11   ;;  %s471_s27 = sand.u32 (!%p458_p12), 1, %s1535_s9  }
  0x47   : > { %461 = sbr.rel (%p458_p12) target bundleno = 421 (0x1a5), region = 99  ;;  %s1175_s28 = sshll.u32 (!%p458_p12), %s464_s25, 8 }
  0x48   : > { %s1176_s29 = sshll.u32 (!%p458_p12), %s471_s27, 7  ;;  %p496_p13 = scmp.lt.s32.totalorder (!%p458_p12), %s1555_s14, 1 }
  0x49   : > { %s1818_s6 = scalar_lea.vmem (!%p458_p12), [#allocation3], %s1175_s28  ;;  %s1820_s7 = scalar_lea.vmem (!%p458_p12), [#allocation4], %s1176_s29 }
  0x4a   : > { %p1178_p0 = scmp.ne.s32.totalorder (!%p458_p12), %s1551_s13, 0 }
  0x4e   : > { %s1919_s14 = smov (!%p496_p13, %s1555_s14), 1  ;;  %504 = sbr.rel (%p1178_p0) target bundleno = 85 (0x55), region = 111 }
  0x4f   : > { %s1177_s30 = sshll.u32 %s1919_s14, 1  ;;  %v1569_v0 = vmov (!%p1178_p0), 0.0  }
  0x50   : > { %s1816_s5 = scalar_lea.vmem %s1902_s2, %s1177_s30  ;;  %505 = vst [vmem:[#allocation2] sm:$0x3] (!%p1178_p0), %v1569_v0 }
  0x55 PF: > { %v1433_v1 = vld [vmem:[%s1820_s7 + $0x40] sm:$0xff]   ;;  %v1435_v3 = vld [vmem:[%s1820_s7 + $0x48] sm:$0xff]   ;;  %v1437_v5 = vld [vmem:[%s1820_s7 + $0x50] sm:$0xff]   ;;  %vm1064_vm0 = vcmask 1041409   ;;  %p1227_p1 = scmp.ne.s32.totalorder %s1551_s13, 1 }
  0x56   : > { %v1434_v2 = vld [vmem:[%s1820_s7] sm:$0xff]   ;;  %1232 = vmatprep.subr.bf16.mxu0 %v1433_v1  ;;  %1344 = vmatprep.subr.bf16.mxu1 %v1433_v1  ;;  %v1436_v4 = vld [vmem:[%s1820_s7 + $0x8] sm:$0xff]   ;;  %v1438_v6 = vld [vmem:[%s1820_s7 + $0x10] sm:$0xff]  }
  0x57   : > { %1233 = vmatpush3.bf16.msra.mxu0 %v1434_v2  ;;  %1352 = vmatpush3.bf16.msra.mxu1 %v1434_v2  ;;  %v1439_v7 = vld [vmem:[%s1820_s7 + $0x58] sm:$0xff]   ;;  %v1441_v9 = vld [vmem:[%s1820_s7 + $0x60] sm:$0xff]   ;;  %v1443_v11 = vld [vmem:[%s1820_s7 + $0x68] sm:$0xff]  }
  0x58   : > { %1234 = vmatprep.subr.bf16.mxu0 %v1435_v3  ;;  %1345 = vmatprep.subr.bf16.mxu1 %v1435_v3  ;;  %v1440_v8 = vld [vmem:[%s1820_s7 + $0x18] sm:$0xff]   ;;  %v1442_v10 = vld [vmem:[%s1820_s7 + $0x20] sm:$0xff]   ;;  %v1444_v14 = vld [vmem:[%s1820_s7 + $0x28] sm:$0xff]  }
  0x59   : > { %v1451_v12 = vld [vmem:[%s1818_s6 + $0x4] ss:$8 sps:$4 sm:$0xff]   ;;  %v1445_v15 = vld [vmem:[%s1820_s7 + $0x70] sm:$0xff]   ;;  %v1447_v17 = vld [vmem:[%s1820_s7 + $0x78] sm:$0xff]  }
  0x5a   : > { %v1454_v13 = vld [vmem:[%s1818_s6 + $0x84] ss:$8 sps:$4 sm:$0xff]   ;;  %858 = vmatprep.mubr.bf16.mxu0 %v1451_v12  ;;  %v1446_v16 = vld [vmem:[%s1820_s7 + $0x30] sm:$0xff]   ;;  %v1448_v18 = vld [vmem:[%s1820_s7 + $0x38] sm:$0xff]  }
  0x5b   : > { %1235 = vmatpush3.bf16.msra.mxu0 %v1436_v4  ;;  %1353 = vmatpush3.bf16.msra.mxu1 %v1436_v4  ;;  %v1449_v19 = vld [vmem:[%s1818_s6] ss:$8 sps:$4 sm:$0xff]   ;;  %v1455_v21 = vld [vmem:[%s1818_s6 + $0x14] ss:$8 sps:$4 sm:$0xff]   ;;  %v1459_v23 = vld [vmem:[%s1818_s6 + $0x10] ss:$8 sps:$4 sm:$0xff]  }
  0x5c   : > { %1236 = vmatprep.subr.bf16.mxu0 %v1437_v5  ;;  %1346 = vmatprep.subr.bf16.mxu1 %v1437_v5  ;;  %v1452_v20 = vld [vmem:[%s1818_s6 + $0x80] ss:$8 sps:$4 sm:$0xff]   ;;  %v1457_v22 = vld [vmem:[%s1818_s6 + $0x94] ss:$8 sps:$4 sm:$0xff]   ;;  %v1460_v24 = vld [vmem:[%s1818_s6 + $0x90] ss:$8 sps:$4 sm:$0xff]  }
  0x5d   : > { %922 = vmatprep.mubr.bf16.mxu1 %v1454_v13  ;;  %v1461_v25 = vld [vmem:[%s1818_s6 + $0x24] ss:$8 sps:$4 sm:$0xff]   ;;  %v1465_v27 = vld [vmem:[%s1818_s6 + $0x20] ss:$8 sps:$4 sm:$0xff]   ;;  %v1467_v29 = vld [vmem:[%s1818_s6 + $0x34] ss:$8 sps:$4 sm:$0xff]  }
  0x5e   : > { %v1463_v26 = vld [vmem:[%s1818_s6 + $0xa4] ss:$8 sps:$4 sm:$0xff]   ;;  %v1466_v28 = vld [vmem:[%s1818_s6 + $0xa0] ss:$8 sps:$4 sm:$0xff]   ;;  %v1469_v30 = vld [vmem:[%s1818_s6 + $0xb4] ss:$8 sps:$4 sm:$0xff]  }
  0x5f   : > { %1237 = vmatpush3.bf16.msra.mxu0 %v1438_v6  ;;  %1354 = vmatpush3.bf16.msra.mxu1 %v1438_v6  ;;  %v1471_v31 = vld [vmem:[%s1818_s6 + $0x30] ss:$8 sps:$4 sm:$0xff]   ;;  %v1473_v33 = vld [vmem:[%s1818_s6 + $0x44] ss:$8 sps:$4 sm:$0xff]   ;;  %v1477_v35 = vld [vmem:[%s1818_s6 + $0x40] ss:$8 sps:$4 sm:$0xff]  }
  0x60   : > { %1238 = vmatprep.subr.bf16.mxu0 %v1439_v7  ;;  %1347 = vmatprep.subr.bf16.mxu1 %v1439_v7  ;;  %v1472_v32 = vld [vmem:[%s1818_s6 + $0xb0] ss:$8 sps:$4 sm:$0xff]   ;;  %v1475_v34 = vld [vmem:[%s1818_s6 + $0xc4] ss:$8 sps:$4 sm:$0xff]   ;;  %v1478_v36 = vld [vmem:[%s1818_s6 + $0xc0] ss:$8 sps:$4 sm:$0xff]  }
  0x61   : > { %v1479_v37 = vld [vmem:[%s1818_s6 + $0x54] ss:$8 sps:$4 sm:$0xff]   ;;  %v1483_v39 = vld [vmem:[%s1818_s6 + $0x50] ss:$8 sps:$4 sm:$0xff]   ;;  %v1485_v41 = vld [vmem:[%s1818_s6 + $0x64] ss:$8 sps:$4 sm:$0xff]  }
  0x62   : > { %v1481_v38 = vld [vmem:[%s1818_s6 + $0xd4] ss:$8 sps:$4 sm:$0xff]   ;;  %v1484_v40 = vld [vmem:[%s1818_s6 + $0xd0] ss:$8 sps:$4 sm:$0xff]   ;;  %v1487_v42 = vld [vmem:[%s1818_s6 + $0xe4] ss:$8 sps:$4 sm:$0xff]  }
  0x63   : > { %1239 = vmatpush3.bf16.msra.mxu0 %v1440_v8  ;;  %1355 = vmatpush3.bf16.msra.mxu1 %v1440_v8  ;;  %v1489_v43 = vld [vmem:[%s1818_s6 + $0x60] ss:$8 sps:$4 sm:$0xff]   ;;  %v1491_v45 = vld [vmem:[%s1818_s6 + $0x74] ss:$8 sps:$4 sm:$0xff]   ;;  %v1495_v47 = vld [vmem:[%s1818_s6 + $0x70] ss:$8 sps:$4 sm:$0xff]  }
  0x64   : > { %1240 = vmatprep.subr.bf16.mxu0 %v1441_v9  ;;  %1348 = vmatprep.subr.bf16.mxu1 %v1441_v9  ;;  %v1490_v44 = vld [vmem:[%s1818_s6 + $0xe0] ss:$8 sps:$4 sm:$0xff]   ;;  %v1493_v46 = vld [vmem:[%s1818_s6 + $0xf4] ss:$8 sps:$4 sm:$0xff]   ;;  %v1496_v48 = vld [vmem:[%s1818_s6 + $0xf0] ss:$8 sps:$4 sm:$0xff]  }
  0x67   : > { %1241 = vmatpush3.bf16.msra.mxu0 %v1442_v10  ;;  %1356 = vmatpush3.bf16.msra.mxu1 %v1442_v10 }
  0x68   : > { %1242 = vmatprep.subr.bf16.mxu0 %v1443_v11  ;;  %1349 = vmatprep.subr.bf16.mxu1 %v1443_v11 }
  0x6b   : > { %1243 = vmatpush3.bf16.msra.mxu0 %v1444_v14  ;;  %1357 = vmatpush3.bf16.msra.mxu1 %v1444_v14 }
  0x6c   : > { %1244 = vmatprep.subr.bf16.mxu0 %v1445_v15  ;;  %1350 = vmatprep.subr.bf16.mxu1 %v1445_v15 }
  0x6f   : > { %1245 = vmatpush3.bf16.msra.mxu0 %v1446_v16  ;;  %1358 = vmatpush3.bf16.msra.mxu1 %v1446_v16 }
  0x70   : > { %1246 = vmatprep.subr.bf16.mxu0 %v1447_v17  ;;  %1351 = vmatprep.subr.bf16.mxu1 %v1447_v17 }
  0x73   : > { %1247 = vmatpush3.bf16.msra.mxu0 %v1448_v18  ;;  %1359 = vmatpush3.bf16.msra.mxu1 %v1448_v18 }
  0x76   : > { %859 = vmatmul.mubr.bf16.vlgmr.msra.gmra.mrb[0].mxu0 %v1449_v19  ;;  %923 = vmatmul.mubr.bf16.vlgmr.msra.gmra.mrb[0].mxu1 %v1452_v20 }
  0x77   : > { %866 = vmatprep.mubr.bf16.mxu0 %v1455_v21  ;;  %930 = vmatprep.mubr.bf16.mxu1 %v1457_v22 }
  0x7e   : > { %867 = vmatmul.mubr.bf16.gmra.mrb[4].mxu0 %v1459_v23  ;;  %931 = vmatmul.mubr.bf16.gmra.mrb[4].mxu1 %v1460_v24 }
  0x7f   : > { %874 = vmatprep.mubr.bf16.mxu0 %v1461_v25  ;;  %938 = vmatprep.mubr.bf16.mxu1 %v1463_v26 }
  0x86   : > { %875 = vmatmul.mubr.bf16.gmra.mrb[8].mxu0 %v1465_v27  ;;  %939 = vmatmul.mubr.bf16.gmra.mrb[8].mxu1 %v1466_v28 }
  0x87   : > { %882 = vmatprep.mubr.bf16.mxu0 %v1467_v29  ;;  %946 = vmatprep.mubr.bf16.mxu1 %v1469_v30 }
  0x8e   : > { %883 = vmatmul.mubr.bf16.gmra.mrb[12].mxu0 %v1471_v31  ;;  %947 = vmatmul.mubr.bf16.gmra.mrb[12].mxu1 %v1472_v32 }
  0x8f   : > { %890 = vmatprep.mubr.bf16.mxu0 %v1473_v33  ;;  %954 = vmatprep.mubr.bf16.mxu1 %v1475_v34 }
  0x96   : > { %891 = vmatmul.mubr.bf16.gmra.mrb[16].mxu0 %v1477_v35  ;;  %955 = vmatmul.mubr.bf16.gmra.mrb[16].mxu1 %v1478_v36 }
  0x97   : > { %898 = vmatprep.mubr.bf16.mxu0 %v1479_v37  ;;  %962 = vmatprep.mubr.bf16.mxu1 %v1481_v38 }
  0x9e   : > { %899 = vmatmul.mubr.bf16.gmra.mrb[20].mxu0 %v1483_v39  ;;  %963 = vmatmul.mubr.bf16.gmra.mrb[20].mxu1 %v1484_v40 }
  0x9f   : > { %906 = vmatprep.mubr.bf16.mxu0 %v1485_v41  ;;  %970 = vmatprep.mubr.bf16.mxu1 %v1487_v42 }
  0xa6   : > { %907 = vmatmul.mubr.bf16.gmra.mrb[24].mxu0 %v1489_v43  ;;  %971 = vmatmul.mubr.bf16.gmra.mrb[24].mxu1 %v1490_v44 }
  0xa7   : > { %914 = vmatprep.mubr.bf16.mxu0 %v1491_v45  ;;  %978 = vmatprep.mubr.bf16.mxu1 %v1493_v46 }
  0xae   : > { %915 = vmatmul.mubr.bf16.gmra.mrb[28].mxu0 %v1495_v47  ;;  %979 = vmatmul.mubr.bf16.gmra.mrb[28].mxu1 %v1496_v48 }
 0x149   : > { %v1248_v49 = vpop.f32.mrb[0].mxu0  ;;  %v1296_v50 = vpop.f32.mrb[0].mxu1 }
 0x14a   : > { %v1249_v51 = vpop.f32.mrb[1].mxu0  ;;  %v1297_v52 = vpop.f32.mrb[1].mxu1 }
 0x14b   : > { %v1250_v53 = vadd.f32 %v1249_v51, %v1248_v49  ;;  %v1298_v54 = vadd.f32 %v1297_v52, %v1296_v50  ;;  %v1251_v55 = vpop.f32.mrb[2].mxu0  ;;  %v1299_v56 = vpop.f32.mrb[2].mxu1 }
 0x14c   : > { %v1252_v57 = vpop.f32.mrb[3].mxu0  ;;  %v1300_v58 = vpop.f32.mrb[3].mxu1 }
 0x14d   : > { %v1253_v59 = vadd.f32 %v1252_v57, %v1251_v55  ;;  %v1301_v60 = vadd.f32 %v1300_v58, %v1299_v56  ;;  %v987_v61 = vmax.f32 %v1250_v53, 0.0  ;;  %v1003_v62 = vmax.f32 %v1298_v54, 0.0 }
 0x14f   : > { %v988_v63 = vmax.f32 %v1253_v59, 0.0  ;;  %v1004_v0 = vmax.f32 %v1301_v60, 0.0 }
 0x151   : > { %v1020_v1 = vadd.f32 %v988_v63, %v987_v61  ;;  %v1041_v2 = vadd.f32 %v1004_v0, %v1003_v62  ;;  %v1254_v3 = vpop.f32.mrb[4].mxu0  ;;  %v1302_v4 = vpop.f32.mrb[4].mxu1 }
 0x152   : > { %v1255_v5 = vpop.f32.mrb[5].mxu0  ;;  %v1303_v6 = vpop.f32.mrb[5].mxu1 }
 0x153   : > { %v1256_v7 = vadd.f32 %v1255_v5, %v1254_v3  ;;  %v1304_v8 = vadd.f32 %v1303_v6, %v1302_v4  ;;  %v1257_v9 = vpop.f32.mrb[6].mxu0  ;;  %v1305_v10 = vpop.f32.mrb[6].mxu1 }
 0x154   : > { %v1258_v11 = vpop.f32.mrb[7].mxu0  ;;  %v1306_v12 = vpop.f32.mrb[7].mxu1 }
 0x155   : > { %v989_v13 = vmax.f32 %v1256_v7, 0.0  ;;  %v1005_v14 = vmax.f32 %v1304_v8, 0.0  ;;  %v1259_v15 = vadd.f32 %v1258_v11, %v1257_v9  ;;  %v1307_v16 = vadd.f32 %v1306_v12, %v1305_v10 }
 0x157   : > { %v1021_v17 = vadd.f32 %v1020_v1, %v989_v13  ;;  %v1042_v18 = vadd.f32 %v1041_v2, %v1005_v14  ;;  %v990_v19 = vmax.f32 %v1259_v15, 0.0  ;;  %v1006_v20 = vmax.f32 %v1307_v16, 0.0 }
 0x159   : > { %v1022_v21 = vadd.f32 %v1021_v17, %v990_v19  ;;  %v1043_v22 = vadd.f32 %v1042_v18, %v1006_v20  ;;  %v1260_v23 = vpop.f32.mrb[8].mxu0  ;;  %v1308_v24 = vpop.f32.mrb[8].mxu1 }
 0x15a   : > { %v1261_v25 = vpop.f32.mrb[9].mxu0  ;;  %v1309_v26 = vpop.f32.mrb[9].mxu1 }
 0x15b   : > { %v1262_v27 = vadd.f32 %v1261_v25, %v1260_v23  ;;  %v1310_v28 = vadd.f32 %v1309_v26, %v1308_v24  ;;  %v1263_v29 = vpop.f32.mrb[10].mxu0  ;;  %v1311_v30 = vpop.f32.mrb[10].mxu1 }
 0x15c   : > { %v1264_v31 = vpop.f32.mrb[11].mxu0  ;;  %v1312_v32 = vpop.f32.mrb[11].mxu1 }
 0x15d   : > { %v991_v33 = vmax.f32 %v1262_v27, 0.0  ;;  %v1007_v34 = vmax.f32 %v1310_v28, 0.0  ;;  %v1265_v35 = vadd.f32 %v1264_v31, %v1263_v29  ;;  %v1313_v36 = vadd.f32 %v1312_v32, %v1311_v30 }
 0x15f   : > { %v1023_v37 = vadd.f32 %v1022_v21, %v991_v33  ;;  %v1044_v38 = vadd.f32 %v1043_v22, %v1007_v34  ;;  %v992_v39 = vmax.f32 %v1265_v35, 0.0  ;;  %v1008_v40 = vmax.f32 %v1313_v36, 0.0 }
 0x161   : > { %v1024_v41 = vadd.f32 %v1023_v37, %v992_v39  ;;  %v1045_v42 = vadd.f32 %v1044_v38, %v1008_v40  ;;  %v1266_v43 = vpop.f32.mrb[12].mxu0  ;;  %v1314_v44 = vpop.f32.mrb[12].mxu1 }
 0x162   : > { %v1267_v45 = vpop.f32.mrb[13].mxu0  ;;  %v1315_v46 = vpop.f32.mrb[13].mxu1 }
 0x163   : > { %v1268_v47 = vadd.f32 %v1267_v45, %v1266_v43  ;;  %v1316_v48 = vadd.f32 %v1315_v46, %v1314_v44  ;;  %v1269_v49 = vpop.f32.mrb[14].mxu0  ;;  %v1317_v50 = vpop.f32.mrb[14].mxu1 }
 0x164   : > { %v1270_v51 = vpop.f32.mrb[15].mxu0  ;;  %v1318_v52 = vpop.f32.mrb[15].mxu1 }
 0x165   : > { %v993_v53 = vmax.f32 %v1268_v47, 0.0  ;;  %v1009_v54 = vmax.f32 %v1316_v48, 0.0  ;;  %v1271_v55 = vadd.f32 %v1270_v51, %v1269_v49  ;;  %v1319_v56 = vadd.f32 %v1318_v52, %v1317_v50 }
 0x167   : > { %v1025_v57 = vadd.f32 %v1024_v41, %v993_v53  ;;  %v1046_v58 = vadd.f32 %v1045_v42, %v1009_v54  ;;  %v994_v59 = vmax.f32 %v1271_v55, 0.0  ;;  %v1010_v60 = vmax.f32 %v1319_v56, 0.0 }
 0x169   : > { %v1026_v61 = vadd.f32 %v1025_v57, %v994_v59  ;;  %v1047_v62 = vadd.f32 %v1046_v58, %v1010_v60  ;;  %v1272_v63 = vpop.f32.mrb[16].mxu0  ;;  %v1320_v0 = vpop.f32.mrb[16].mxu1 }
 0x16a   : > { %v1273_v1 = vpop.f32.mrb[17].mxu0  ;;  %v1321_v2 = vpop.f32.mrb[17].mxu1 }
 0x16b   : > { %v1274_v3 = vadd.f32 %v1273_v1, %v1272_v63  ;;  %v1322_v4 = vadd.f32 %v1321_v2, %v1320_v0  ;;  %v1275_v5 = vpop.f32.mrb[18].mxu0  ;;  %v1323_v6 = vpop.f32.mrb[18].mxu1 }
 0x16c   : > { %v1276_v7 = vpop.f32.mrb[19].mxu0  ;;  %v1324_v8 = vpop.f32.mrb[19].mxu1 }
 0x16d   : > { %v995_v9 = vmax.f32 %v1274_v3, 0.0  ;;  %v1011_v10 = vmax.f32 %v1322_v4, 0.0  ;;  %v1277_v11 = vadd.f32 %v1276_v7, %v1275_v5  ;;  %v1325_v12 = vadd.f32 %v1324_v8, %v1323_v6 }
 0x16f   : > { %v1027_v13 = vadd.f32 %v1026_v61, %v995_v9  ;;  %v1048_v14 = vadd.f32 %v1047_v62, %v1011_v10  ;;  %v996_v15 = vmax.f32 %v1277_v11, 0.0  ;;  %v1012_v16 = vmax.f32 %v1325_v12, 0.0 }
 0x171   : > { %v1028_v17 = vadd.f32 %v1027_v13, %v996_v15  ;;  %v1049_v18 = vadd.f32 %v1048_v14, %v1012_v16  ;;  %v1278_v19 = vpop.f32.mrb[20].mxu0  ;;  %v1326_v20 = vpop.f32.mrb[20].mxu1 }
 0x172   : > { %v1279_v21 = vpop.f32.mrb[21].mxu0  ;;  %v1327_v22 = vpop.f32.mrb[21].mxu1 }
 0x173   : > { %v1280_v23 = vadd.f32 %v1279_v21, %v1278_v19  ;;  %v1328_v24 = vadd.f32 %v1327_v22, %v1326_v20  ;;  %v1281_v25 = vpop.f32.mrb[22].mxu0  ;;  %v1329_v26 = vpop.f32.mrb[22].mxu1 }
 0x174   : > { %v1282_v27 = vpop.f32.mrb[23].mxu0  ;;  %v1330_v28 = vpop.f32.mrb[23].mxu1 }
 0x175   : > { %v997_v29 = vmax.f32 %v1280_v23, 0.0  ;;  %v1013_v30 = vmax.f32 %v1328_v24, 0.0  ;;  %v1283_v31 = vadd.f32 %v1282_v27, %v1281_v25  ;;  %v1331_v32 = vadd.f32 %v1330_v28, %v1329_v26  ;;  %v1019_v26 = vld [vmem:[#allocation2] sm:$0x3] }
 0x177   : > { %v1029_v33 = vadd.f32 %v1028_v17, %v997_v29  ;;  %v1050_v34 = vadd.f32 %v1049_v18, %v1013_v30  ;;  %v998_v35 = vmax.f32 %v1283_v31, 0.0  ;;  %v1014_v36 = vmax.f32 %v1331_v32, 0.0 }
 0x179   : > { %v1030_v37 = vadd.f32 %v1029_v33, %v998_v35  ;;  %v1051_v38 = vadd.f32 %v1050_v34, %v1014_v36  ;;  %v1284_v39 = vpop.f32.mrb[24].mxu0  ;;  %v1332_v40 = vpop.f32.mrb[24].mxu1 }
 0x17a   : > { %v1285_v41 = vpop.f32.mrb[25].mxu0  ;;  %v1333_v42 = vpop.f32.mrb[25].mxu1 }
 0x17b   : > { %v1286_v43 = vadd.f32 %v1285_v41, %v1284_v39  ;;  %v1334_v44 = vadd.f32 %v1333_v42, %v1332_v40  ;;  %v1287_v45 = vpop.f32.mrb[26].mxu0  ;;  %v1335_v46 = vpop.f32.mrb[26].mxu1 }
 0x17c   : > { %v1288_v47 = vpop.f32.mrb[27].mxu0  ;;  %v1336_v48 = vpop.f32.mrb[27].mxu1 }
 0x17d   : > { %v999_v49 = vmax.f32 %v1286_v43, 0.0  ;;  %v1015_v50 = vmax.f32 %v1334_v44, 0.0  ;;  %v1289_v51 = vadd.f32 %v1288_v47, %v1287_v45  ;;  %v1337_v52 = vadd.f32 %v1336_v48, %v1335_v46 }
 0x17f   : > { %v1031_v53 = vadd.f32 %v1030_v37, %v999_v49  ;;  %v1052_v54 = vadd.f32 %v1051_v38, %v1015_v50  ;;  %v1000_v55 = vmax.f32 %v1289_v51, 0.0  ;;  %v1016_v56 = vmax.f32 %v1337_v52, 0.0 }
 0x181   : > { %v1032_v57 = vadd.f32 %v1031_v53, %v1000_v55  ;;  %v1053_v58 = vadd.f32 %v1052_v54, %v1016_v56  ;;  %v1290_v59 = vpop.f32.mrb[28].mxu0  ;;  %v1338_v60 = vpop.f32.mrb[28].mxu1 }
 0x182   : > { %v1291_v61 = vpop.f32.mrb[29].mxu0  ;;  %v1339_v62 = vpop.f32.mrb[29].mxu1 }
 0x183   : > { %v1292_v63 = vadd.f32 %v1291_v61, %v1290_v59  ;;  %v1340_v0 = vadd.f32 %v1339_v62, %v1338_v60  ;;  %v1293_v1 = vpop.f32.mrb[30].mxu0  ;;  %v1341_v2 = vpop.f32.mrb[30].mxu1 }
 0x184   : > { %v1294_v3 = vpop.f32.mrb[31].mxu0  ;;  %v1342_v4 = vpop.f32.mrb[31].mxu1 }
 0x185   : > { %v1001_v5 = vmax.f32 %v1292_v63, 0.0  ;;  %v1017_v6 = vmax.f32 %v1340_v0, 0.0  ;;  %v1295_v7 = vadd.f32 %v1294_v3, %v1293_v1  ;;  %v1343_v8 = vadd.f32 %v1342_v4, %v1341_v2 }
 0x187   : > { %v1033_v9 = vadd.f32 %v1032_v57, %v1001_v5  ;;  %v1054_v10 = vadd.f32 %v1053_v58, %v1017_v6  ;;  %v1002_v11 = vmax.f32 %v1295_v7, 0.0  ;;  %v1018_v12 = vmax.f32 %v1343_v8, 0.0 }
 0x189   : > { %v1034_v13 = vadd.f32 %v1033_v9, %v1002_v11  ;;  %v1055_v14 = vadd.f32 %v1054_v10, %v1018_v12 }
 0x18b   : > { %v1035_v15 = vrot.slane %v1034_v13, 4  ;;  %v1056_v16 = vrot.slane %v1055_v14, 4 }
 0x18d   : > { %v1036_v17 = vadd.f32 %v1035_v15, %v1034_v13  ;;  %v1057_v18 = vadd.f32 %v1056_v16, %v1055_v14 }
 0x18f   : > { %v1037_v19 = vrot.slane %v1036_v17, 2  ;;  %v1058_v20 = vrot.slane %v1057_v18, 2 }
 0x191   : > { %v1038_v21 = vadd.f32 %v1037_v19, %v1036_v17  ;;  %v1059_v22 = vadd.f32 %v1058_v20, %v1057_v18 }
 0x193   : > { %v1039_v23 = vrot.slane %v1038_v21, 1  ;;  %v1060_v24 = vrot.slane %v1059_v22, 1 }
 0x194   : > { %1072 = sbr.rel (%p1227_p1) target bundleno = 421 (0x1a5), region = 115 }
 0x195   : > { %v1040_v25 = vadd.f32 %v1039_v23, %v1038_v21  ;;  %v1061_v27 = vadd.f32 %v1060_v24, %v1059_v22 }
 0x197   : > { %v1065_v28 = vsel %vm1064_vm0, %v1061_v27, %v1040_v25 }
 0x198   : > { %v1067_v29 = vadd.f32 %v1065_v28, %v1019_v26 }
 0x19a   : > { %1068 = vst [vmem:[#allocation2] sm:$0x3] %v1067_v29 }
 0x1a1   : > { %v1073_v30 = vld [vmem:[#allocation2] sm:$0x3] }
 0x1a2   : > { %v1074_v31 = vmul.f32 0.00390625, %v1073_v30 }
 0x1a4   : > { %1075 = vst [vmem:[%s1816_s5] sm:$0x3] %v1074_v31 }
 0x1a5 PF: > { %s12_s17 = sadd.s32 1, %s1567_s17   ;;  %s1904_s9 = smov %s1539_s10 }
 0x1a6   : > { %p9_p2 = scmp.ge.s32.totalorder %s12_s17, 6   ;;  %s1905_s10 = smov %s1656_s26 }
 0x1a7   : > { %s1906_s11 = smov %s1547_s12  ;;  %s1907_s12 = smov %s1647_s23 }
 0x1a8   : > { %s1908_s13 = smov %s1559_s15  ;;  %s1909_s14 = smov %s1563_s16 }
 0x1a9   : > { %s1910_s15 = smov %s1913_s18  ;;  %s1911_s16 = smov %s1917_s19 }
 0x1aa   :  { %11 = sbr.rel (!%p9_p2) target bundleno = 5 (0x5), region = 158 }

// kernel: byol_forward.3
= control target key start
LH: loop header
LB: loop body
LE: loop exit
PB: predicated region body
PF: predicated region fallthrough
CT: control target
= control target key end

     0   :  { %s1726_s0 = inlined_call_operand.vmem [shape: f32[2,256], index: 0, kind: input, shape index: {}]   ;;  %s1727_s1 = inlined_call_operand.vmem [shape: bf16[256,512], index: 1, kind: input, shape index: {}]   ;;  %s1728_s2 = inlined_call_operand.vmem [shape: f32[1,512], index: 2, kind: input, shape index: {}]   ;;  %s1729_s3 = inlined_call_operand.vmem [shape: f32[1,512], index: 3, kind: input, shape index: {}]   ;;  %s1730_s4 = inlined_call_operand.vmem [shape: f32[1,512], index: 4, kind: input, shape index: {}]   ;;  %s1731_s5 = inlined_call_operand.vmem [shape: bf16[512,128], index: 5, kind: input, shape index: {}]   ;;  %s1732_s6 = inlined_call_operand.vmem [shape: f32[1,128], index: 6, kind: input, shape index: {}]   ;;  %s1733_s7 = inlined_call_operand.hbm [shape: f32[2,128], index: 7, kind: output, shape index: {}]  }
   0x1   :  { %v1177_v0 = vld [vmem:[%s1727_s1 + $0x4] ss:$16 sps:$4 sm:$0xff]   ;;  %v1179_v1 = vld [vmem:[%s1727_s1 + $0xc] ss:$16 sps:$4 sm:$0xff]   ;;  %v1181_v2 = vld [vmem:[%s1727_s1] ss:$16 sps:$4 sm:$0xff]  }
   0x2   :  { %448 = vmatprep.subr.bf16.mxu0 %v1177_v0  ;;  %v1182_v3 = vld [vmem:[%s1727_s1 + $0x8] ss:$16 sps:$4 sm:$0xff]   ;;  %489 = vmatprep.subr.bf16.mxu1 %v1179_v1  ;;  %v1183_v4 = vld [vmem:[%s1727_s1 + $0x24] ss:$16 sps:$4 sm:$0xff]   ;;  %v1185_v5 = vld [vmem:[%s1727_s1 + $0x2c] ss:$16 sps:$4 sm:$0xff]  }
   0x3   :  { %449 = vmatpush1.bf16.msra.mxu0 %v1181_v2  ;;  %490 = vmatpush1.bf16.msra.mxu1 %v1182_v3  ;;  %v1187_v6 = vld [vmem:[%s1727_s1 + $0x20] ss:$16 sps:$4 sm:$0xff]   ;;  %v1188_v7 = vld [vmem:[%s1727_s1 + $0x28] ss:$16 sps:$4 sm:$0xff]   ;;  %v1189_v8 = vld [vmem:[%s1727_s1 + $0x44] ss:$16 sps:$4 sm:$0xff]  }
   0x4   :  { %450 = vmatprep.subr.bf16.mxu0 %v1183_v4  ;;  %491 = vmatprep.subr.bf16.mxu1 %v1185_v5  ;;  %v1191_v9 = vld [vmem:[%s1727_s1 + $0x4c] ss:$16 sps:$4 sm:$0xff]   ;;  %v1193_v10 = vld [vmem:[%s1727_s1 + $0x40] ss:$16 sps:$4 sm:$0xff]   ;;  %v1194_v11 = vld [vmem:[%s1727_s1 + $0x48] ss:$16 sps:$4 sm:$0xff]  }
   0x5   :  { %v1195_v12 = vld [vmem:[%s1727_s1 + $0x64] ss:$16 sps:$4 sm:$0xff]   ;;  %v1197_v13 = vld [vmem:[%s1727_s1 + $0x6c] ss:$16 sps:$4 sm:$0xff]   ;;  %v1199_v14 = vld [vmem:[%s1727_s1 + $0x60] ss:$16 sps:$4 sm:$0xff]  }
   0x6   :  { %v1200_v15 = vld [vmem:[%s1727_s1 + $0x68] ss:$16 sps:$4 sm:$0xff]   ;;  %v1201_v16 = vld [vmem:[%s1727_s1 + $0x84] ss:$16 sps:$4 sm:$0xff]   ;;  %v1203_v17 = vld [vmem:[%s1727_s1 + $0x8c] ss:$16 sps:$4 sm:$0xff]  }
   0x7   :  { %451 = vmatpush1.bf16.msra.mxu0 %v1187_v6  ;;  %492 = vmatpush1.bf16.msra.mxu1 %v1188_v7  ;;  %v1205_v18 = vld [vmem:[%s1727_s1 + $0x80] ss:$16 sps:$4 sm:$0xff]   ;;  %v1206_v19 = vld [vmem:[%s1727_s1 + $0x88] ss:$16 sps:$4 sm:$0xff]   ;;  %v1207_v20 = vld [vmem:[%s1727_s1 + $0xa4] ss:$16 sps:$4 sm:$0xff]  }
   0x8   :  { %452 = vmatprep.subr.bf16.mxu0 %v1189_v8  ;;  %493 = vmatprep.subr.bf16.mxu1 %v1191_v9  ;;  %v1209_v21 = vld [vmem:[%s1727_s1 + $0xac] ss:$16 sps:$4 sm:$0xff]   ;;  %v1211_v22 = vld [vmem:[%s1727_s1 + $0xa0] ss:$16 sps:$4 sm:$0xff]   ;;  %v1212_v23 = vld [vmem:[%s1727_s1 + $0xa8] ss:$16 sps:$4 sm:$0xff]  }
   0x9   :  { %v1213_v24 = vld [vmem:[%s1727_s1 + $0xc4] ss:$16 sps:$4 sm:$0xff]   ;;  %v1215_v25 = vld [vmem:[%s1727_s1 + $0xcc] ss:$16 sps:$4 sm:$0xff]   ;;  %v1217_v26 = vld [vmem:[%s1727_s1 + $0xc0] ss:$16 sps:$4 sm:$0xff]  }
   0xa   :  { %v1218_v27 = vld [vmem:[%s1727_s1 + $0xc8] ss:$16 sps:$4 sm:$0xff]   ;;  %v1219_v28 = vld [vmem:[%s1727_s1 + $0xe4] ss:$16 sps:$4 sm:$0xff]   ;;  %v1221_v29 = vld [vmem:[%s1727_s1 + $0xec] ss:$16 sps:$4 sm:$0xff]  }
   0xb   :  { %453 = vmatpush1.bf16.msra.mxu0 %v1193_v10  ;;  %494 = vmatpush1.bf16.msra.mxu1 %v1194_v11  ;;  %v1223_v30 = vld [vmem:[%s1727_s1 + $0xe0] ss:$16 sps:$4 sm:$0xff]   ;;  %v1224_v31 = vld [vmem:[%s1727_s1 + $0xe8] ss:$16 sps:$4 sm:$0xff]   ;;  %v1225_v32 = vld [vmem:[%s1727_s1 + $0x104] ss:$16 sps:$4 sm:$0xff]  }
   0xc   :  { %454 = vmatprep.subr.bf16.mxu0 %v1195_v12  ;;  %495 = vmatprep.subr.bf16.mxu1 %v1197_v13  ;;  %v1227_v33 = vld [vmem:[%s1727_s1 + $0x10c] ss:$16 sps:$4 sm:$0xff]   ;;  %v1229_v34 = vld [vmem:[%s1727_s1 + $0x100] ss:$16 sps:$4 sm:$0xff]   ;;  %v1230_v35 = vld [vmem:[%s1727_s1 + $0x108] ss:$16 sps:$4 sm:$0xff]  }
   0xd   :  { %v1231_v36 = vld [vmem:[%s1727_s1 + $0x124] ss:$16 sps:$4 sm:$0xff]   ;;  %v1233_v37 = vld [vmem:[%s1727_s1 + $0x12c] ss:$16 sps:$4 sm:$0xff]   ;;  %v1235_v38 = vld [vmem:[%s1727_s1 + $0x120] ss:$16 sps:$4 sm:$0xff]  }
   0xe   :  { %v1236_v39 = vld [vmem:[%s1727_s1 + $0x128] ss:$16 sps:$4 sm:$0xff]   ;;  %v1237_v40 = vld [vmem:[%s1727_s1 + $0x144] ss:$16 sps:$4 sm:$0xff]   ;;  %v1239_v41 = vld [vmem:[%s1727_s1 + $0x14c] ss:$16 sps:$4 sm:$0xff]  }
   0xf   :  { %455 = vmatpush1.bf16.msra.mxu0 %v1199_v14  ;;  %496 = vmatpush1.bf16.msra.mxu1 %v1200_v15  ;;  %v1241_v42 = vld [vmem:[%s1727_s1 + $0x140] ss:$16 sps:$4 sm:$0xff]   ;;  %v1242_v43 = vld [vmem:[%s1727_s1 + $0x148] ss:$16 sps:$4 sm:$0xff]   ;;  %v1243_v44 = vld [vmem:[%s1727_s1 + $0x164] ss:$16 sps:$4 sm:$0xff]  }
  0x10   :  { %456 = vmatprep.subr.bf16.mxu0 %v1201_v16  ;;  %497 = vmatprep.subr.bf16.mxu1 %v1203_v17  ;;  %v1245_v45 = vld [vmem:[%s1727_s1 + $0x16c] ss:$16 sps:$4 sm:$0xff]   ;;  %v1247_v46 = vld [vmem:[%s1727_s1 + $0x160] ss:$16 sps:$4 sm:$0xff]   ;;  %v1248_v47 = vld [vmem:[%s1727_s1 + $0x168] ss:$16 sps:$4 sm:$0xff]  }
  0x11   :  { %v1249_v48 = vld [vmem:[%s1727_s1 + $0x184] ss:$16 sps:$4 sm:$0xff]   ;;  %v1251_v49 = vld [vmem:[%s1727_s1 + $0x18c] ss:$16 sps:$4 sm:$0xff]   ;;  %v1253_v52 = vld [vmem:[%s1727_s1 + $0x180] ss:$16 sps:$4 sm:$0xff]  }
  0x12   :  { %v1034_v50 = vld.sshfl [vmem:[%s1726_s0] sm:$0x33 pattern:$0x76325410]  ;;  %v1254_v53 = vld [vmem:[%s1727_s1 + $0x188] ss:$16 sps:$4 sm:$0xff]  }
  0x13   :  { %457 = vmatpush1.bf16.msra.mxu0 %v1205_v18  ;;  %498 = vmatpush1.bf16.msra.mxu1 %v1206_v19  ;;  %v37_v51 = vcombine.high %v1034_v50, %v1034_v50  ;;  %v1255_v55 = vld [vmem:[%s1727_s1 + $0x1a4] ss:$16 sps:$4 sm:$0xff]   ;;  %v1257_v56 = vld [vmem:[%s1727_s1 + $0x1ac] ss:$16 sps:$4 sm:$0xff]   ;;  %v1259_v57 = vld [vmem:[%s1727_s1 + $0x1a0] ss:$16 sps:$4 sm:$0xff]   ;;  %v40_v3 = vpack.c.bf16 %v1034_v50, %v1034_v50 }
  0x14   :  { %458 = vmatprep.subr.bf16.mxu0 %v1207_v20  ;;  %499 = vmatprep.subr.bf16.mxu1 %v1209_v21  ;;  %v1260_v58 = vld [vmem:[%s1727_s1 + $0x1a8] ss:$16 sps:$4 sm:$0xff]   ;;  %v1261_v59 = vld [vmem:[%s1727_s1 + $0x1c4] ss:$16 sps:$4 sm:$0xff]   ;;  %v1263_v60 = vld [vmem:[%s1727_s1 + $0x1cc] ss:$16 sps:$4 sm:$0xff]  }
  0x15   :  { %v41_v54 = vpack.c.bf16 %v37_v51, %v37_v51  ;;  %v1265_v61 = vld [vmem:[%s1727_s1 + $0x1c0] ss:$16 sps:$4 sm:$0xff]   ;;  %v1266_v62 = vld [vmem:[%s1727_s1 + $0x1c8] ss:$16 sps:$4 sm:$0xff]   ;;  %v1267_v63 = vld [vmem:[%s1727_s1 + $0x1e4] ss:$16 sps:$4 sm:$0xff]  }
  0x16   :  { %v1269_v0 = vld [vmem:[%s1727_s1 + $0x1ec] ss:$16 sps:$4 sm:$0xff]   ;;  %v1271_v1 = vld [vmem:[%s1727_s1 + $0x1e0] ss:$16 sps:$4 sm:$0xff]   ;;  %v1272_v2 = vld [vmem:[%s1727_s1 + $0x1e8] ss:$16 sps:$4 sm:$0xff]  }
  0x17   :  { %459 = vmatpush1.bf16.msra.mxu0 %v1211_v22  ;;  %500 = vmatpush1.bf16.msra.mxu1 %v1212_v23 }
  0x18   :  { %460 = vmatprep.subr.bf16.mxu0 %v1213_v24  ;;  %501 = vmatprep.subr.bf16.mxu1 %v1215_v25 }
  0x19   :  { %480 = vmatprep.mubr.bf16.mxu0 %v41_v54  ;;  %521 = vmatprep.mubr.bf16.mxu1 %v41_v54 }
  0x1b   :  { %461 = vmatpush1.bf16.msra.mxu0 %v1217_v26  ;;  %502 = vmatpush1.bf16.msra.mxu1 %v1218_v27 }
  0x1c   :  { %462 = vmatprep.subr.bf16.mxu0 %v1219_v28  ;;  %503 = vmatprep.subr.bf16.mxu1 %v1221_v29 }
  0x1f   :  { %463 = vmatpush1.bf16.msra.mxu0 %v1223_v30  ;;  %504 = vmatpush1.bf16.msra.mxu1 %v1224_v31 }
  0x20   :  { %464 = vmatprep.subr.bf16.mxu0 %v1225_v32  ;;  %505 = vmatprep.subr.bf16.mxu1 %v1227_v33 }
  0x23   :  { %465 = vmatpush1.bf16.msra.mxu0 %v1229_v34  ;;  %506 = vmatpush1.bf16.msra.mxu1 %v1230_v35 }
  0x24   :  { %466 = vmatprep.subr.bf16.mxu0 %v1231_v36  ;;  %507 = vmatprep.subr.bf16.mxu1 %v1233_v37 }
  0x27   :  { %467 = vmatpush1.bf16.msra.mxu0 %v1235_v38  ;;  %508 = vmatpush1.bf16.msra.mxu1 %v1236_v39 }
  0x28   :  { %468 = vmatprep.subr.bf16.mxu0 %v1237_v40  ;;  %509 = vmatprep.subr.bf16.mxu1 %v1239_v41 }
  0x2b   :  { %469 = vmatpush1.bf16.msra.mxu0 %v1241_v42  ;;  %510 = vmatpush1.bf16.msra.mxu1 %v1242_v43 }
  0x2c   :  { %470 = vmatprep.subr.bf16.mxu0 %v1243_v44  ;;  %511 = vmatprep.subr.bf16.mxu1 %v1245_v45 }
  0x2f   :  { %471 = vmatpush1.bf16.msra.mxu0 %v1247_v46  ;;  %512 = vmatpush1.bf16.msra.mxu1 %v1248_v47 }
  0x30   :  { %472 = vmatprep.subr.bf16.mxu0 %v1249_v48  ;;  %513 = vmatprep.subr.bf16.mxu1 %v1251_v49 }
  0x33   :  { %473 = vmatpush1.bf16.msra.mxu0 %v1253_v52  ;;  %514 = vmatpush1.bf16.msra.mxu1 %v1254_v53 }
  0x34   :  { %474 = vmatprep.subr.bf16.mxu0 %v1255_v55  ;;  %515 = vmatprep.subr.bf16.mxu1 %v1257_v56 }
  0x37   :  { %475 = vmatpush1.bf16.msra.mxu0 %v1259_v57  ;;  %516 = vmatpush1.bf16.msra.mxu1 %v1260_v58 }
  0x38   :  { %476 = vmatprep.subr.bf16.mxu0 %v1261_v59  ;;  %517 = vmatprep.subr.bf16.mxu1 %v1263_v60 }
  0x3b   :  { %477 = vmatpush1.bf16.msra.mxu0 %v1265_v61  ;;  %518 = vmatpush1.bf16.msra.mxu1 %v1266_v62 }
  0x3c   :  { %478 = vmatprep.subr.bf16.mxu0 %v1267_v63  ;;  %519 = vmatprep.subr.bf16.mxu1 %v1269_v0 }
  0x3f   :  { %479 = vmatpush1.bf16.msra.mxu0 %v1271_v1  ;;  %520 = vmatpush1.bf16.msra.mxu1 %v1272_v2 }
  0x40   :  { %12 = vsyncpa [#allocation3], 0  ;;  %v1273_v4 = vld [vmem:[%s1731_s5 + $0x40] sm:$0xff]   ;;  %v1277_v8 = vld [vmem:[%s1731_s5 + $0x48] sm:$0xff]   ;;  %v108_v36 = vlaneseq  ;;  %vm530_vm0 = vcmask 1041408   ;;  %s1337_s8 = smov [#allocation2]  }
  0x41   :  { %v1274_v5 = vld [vmem:[%s1731_s5 + $0xc0] sm:$0xff]   ;;  %1132 = vmatprep.subr.bf16.mxu0 %v1273_v4  ;;  %v1278_v9 = vld [vmem:[%s1731_s5 + $0xc8] sm:$0xff]   ;;  %v1281_v12 = vld [vmem:[%s1731_s5 + $0x50] sm:$0xff]   ;;  %s1026_s9 = sshll.u32 %s1337_s8, 4  ;;  %s1027_s9 = int_to_ptr.vmem [resolvable:$true] %s1026_s9 }
  0x42   :  { %481 = vmatmul.mubr.bf16.vlgmr.msra.gmra.mrb[0].mxu0 %v40_v3  ;;  %522 = vmatmul.mubr.bf16.vlgmr.msra.gmra.mrb[0].mxu1 %v40_v3  ;;  %v1275_v6 = vld [vmem:[%s1731_s5] sm:$0xff]   ;;  %v1279_v10 = vld [vmem:[%s1731_s5 + $0x8] sm:$0xff]   ;;  %v1282_v13 = vld [vmem:[%s1731_s5 + $0xd0] sm:$0xff]   ;;  %v109_v37 = vshrl.u32 %v108_v36, 7  ;;  %s1313_s10 = scalar_lea.vmem %s1027_s9, 32  ;;  %p1318_p1 = scmp.lt.s32.totalorder %s1027_s9, %s1027_s9 }
  0x43   :  { %v1276_v7 = vld [vmem:[%s1731_s5 + $0x80] sm:$0xff]   ;;  %1154 = vmatprep.subr.bf16.mxu1 %v1274_v5  ;;  %1133 = vmatpush3.bf16.msra.mxu0 %v1275_v6  ;;  %v1280_v11 = vld [vmem:[%s1731_s5 + $0x88] sm:$0xff]   ;;  %v1283_v14 = vld [vmem:[%s1731_s5 + $0x10] sm:$0xff]   ;;  %p1314_p0 = scmp.ne.s32.totalorder %s1027_s9, %s1313_s10  ;;  %p1319_p2 = scmp.lt.s32.totalorder %s1313_s10, %s1313_s10 }
  0x44   :  { %1155 = vmatpush3.bf16.msra.mxu1 %v1276_v7  ;;  %1134 = vmatprep.subr.bf16.mxu0 %v1277_v8  ;;  %v1284_v15 = vld [vmem:[%s1731_s5 + $0x90] sm:$0xff]   ;;  %v1285_v16 = vld [vmem:[%s1731_s5 + $0x58] sm:$0xff]   ;;  %v1289_v20 = vld [vmem:[%s1731_s5 + $0x60] sm:$0xff]   ;;  %v1669_v38 = vsub.s32 0, %v109_v37  ;;  %v1671_v39 = vsub.s32 2, %v109_v37  ;;  %v1676_v41 = vsub.s32 1, %v109_v37 }
  0x45   :  { %1156 = vmatprep.subr.bf16.mxu1 %v1278_v9  ;;  %v1286_v17 = vld [vmem:[%s1731_s5 + $0xd8] sm:$0xff]   ;;  %v1290_v21 = vld [vmem:[%s1731_s5 + $0xe0] sm:$0xff]   ;;  %v1293_v24 = vld [vmem:[%s1731_s5 + $0x68] sm:$0xff]   ;;  %v1678_v42 = vsub.s32 3, %v109_v37  ;;  %p1320_p3 = por %p1319_p2, %p1318_p1 }
  0x46   :  { %v1287_v18 = vld [vmem:[%s1731_s5 + $0x18] sm:$0xff]   ;;  %v1291_v22 = vld [vmem:[%s1731_s5 + $0x20] sm:$0xff]   ;;  %v1294_v25 = vld [vmem:[%s1731_s5 + $0xe8] sm:$0xff]  }
  0x47   :  { %1135 = vmatpush3.bf16.msra.mxu0 %v1279_v10  ;;  %v1288_v19 = vld [vmem:[%s1731_s5 + $0x98] sm:$0xff]   ;;  %v1292_v23 = vld [vmem:[%s1731_s5 + $0xa0] sm:$0xff]   ;;  %v1295_v26 = vld [vmem:[%s1731_s5 + $0x28] sm:$0xff]   ;;  %p1321_p4 = pnand %p1320_p3, %p1314_p0 }
  0x48   :  { %1157 = vmatpush3.bf16.msra.mxu1 %v1280_v11  ;;  %1136 = vmatprep.subr.bf16.mxu0 %v1281_v12  ;;  %v1296_v27 = vld [vmem:[%s1731_s5 + $0xa8] sm:$0xff]   ;;  %v1297_v28 = vld [vmem:[%s1731_s5 + $0x70] sm:$0xff]   ;;  %v1301_v32 = vld [vmem:[%s1731_s5 + $0x78] sm:$0xff]  }
  0x49   :  { %1158 = vmatprep.subr.bf16.mxu1 %v1282_v13  ;;  %v1298_v29 = vld [vmem:[%s1731_s5 + $0xf0] sm:$0xff]   ;;  %v1302_v33 = vld [vmem:[%s1731_s5 + $0xf8] sm:$0xff]   ;;  %v106_v40 = vld [vmem:[%s1728_s2] sm:$0xf] }
  0x4a   :  { %v1299_v30 = vld [vmem:[%s1731_s5 + $0x30] sm:$0xff]   ;;  %v1303_v34 = vld [vmem:[%s1731_s5 + $0x38] sm:$0xff]   ;;  %v111_v43 = vrot.slane %v106_v40, %v1669_v38  ;;  %v119_v44 = vrot.slane %v106_v40, %v1671_v39  ;;  %v115_v45 = vrot.slane %v106_v40, %v1676_v41  ;;  %v123_v46 = vrot.slane %v106_v40, %v1678_v42 }
  0x4b   :  { %1137 = vmatpush3.bf16.msra.mxu0 %v1283_v14  ;;  %v1300_v31 = vld [vmem:[%s1731_s5 + $0xb0] sm:$0xff]   ;;  %v1304_v35 = vld [vmem:[%s1731_s5 + $0xb8] sm:$0xff]  }
  0x4c   :  { %1159 = vmatpush3.bf16.msra.mxu1 %v1284_v15  ;;  %1138 = vmatprep.subr.bf16.mxu0 %v1285_v16 }
  0x4d   :  { %1160 = vmatprep.subr.bf16.mxu1 %v1286_v17 }
  0x4f   :  { %1139 = vmatpush3.bf16.msra.mxu0 %v1287_v18 }
  0x50   :  { %1161 = vmatpush3.bf16.msra.mxu1 %v1288_v19  ;;  %1140 = vmatprep.subr.bf16.mxu0 %v1289_v20 }
  0x51   :  { %1162 = vmatprep.subr.bf16.mxu1 %v1290_v21 }
  0x53   :  { %1141 = vmatpush3.bf16.msra.mxu0 %v1291_v22 }
  0x54   :  { %1163 = vmatpush3.bf16.msra.mxu1 %v1292_v23  ;;  %1142 = vmatprep.subr.bf16.mxu0 %v1293_v24 }
  0x55   :  { %1164 = vmatprep.subr.bf16.mxu1 %v1294_v25 }
  0x57   :  { %1143 = vmatpush3.bf16.msra.mxu0 %v1295_v26 }
  0x58   :  { %1165 = vmatpush3.bf16.msra.mxu1 %v1296_v27  ;;  %1144 = vmatprep.subr.bf16.mxu0 %v1297_v28 }
  0x59   :  { %1166 = vmatprep.subr.bf16.mxu1 %v1298_v29 }
  0x5b   :  { %1145 = vmatpush3.bf16.msra.mxu0 %v1299_v30 }
  0x5c   :  { %1167 = vmatpush3.bf16.msra.mxu1 %v1300_v31  ;;  %1146 = vmatprep.subr.bf16.mxu0 %v1301_v32 }
  0x5d   :  { %1168 = vmatprep.subr.bf16.mxu1 %v1302_v33 }
  0x5f   :  { %1147 = vmatpush3.bf16.msra.mxu0 %v1303_v34 }
  0x60   :  { %1169 = vmatpush3.bf16.msra.mxu1 %v1304_v35 }
 0x115   :  { %v482_v47 = vpop.f32.mrb[0].mxu0  ;;  %v523_v48 = vpop.f32.mrb[0].mxu1 }
 0x116   :  { %v483_v49 = vadd.f32 %v482_v47, %v111_v43  ;;  %v524_v50 = vadd.f32 %v523_v48, %v119_v44  ;;  %v484_v51 = vpop.f32.mrb[1].mxu0  ;;  %v525_v52 = vpop.f32.mrb[1].mxu1 }
 0x117   :  { %v485_v53 = vadd.f32 %v484_v51, %v115_v45  ;;  %v526_v54 = vadd.f32 %v525_v52, %v123_v46  ;;  %v486_v55 = vpop.f32.mrb[2].mxu0  ;;  %v527_v56 = vpop.f32.mrb[2].mxu1 }
 0x118   :  { %v531_v57 = vsel %vm530_vm0, %v483_v49, 0.0  ;;  %v545_v58 = vsel %vm530_vm0, %v524_v50, 0.0  ;;  %v487_v59 = vpop.f32.mrb[3].mxu0  ;;  %v528_v60 = vpop.f32.mrb[3].mxu1 }
 0x119   :  { %v532_v61 = vrot.slane %v531_v57, 4  ;;  %v546_v62 = vrot.slane %v545_v58, 4  ;;  %v538_v63 = vsel %vm530_vm0, %v485_v53, 0.0  ;;  %v552_v0 = vsel %vm530_vm0, %v526_v54, 0.0 }
 0x11a   :  { %v539_v1 = vrot.slane %v538_v63, 4  ;;  %v553_v2 = vrot.slane %v552_v0, 4 }
 0x11b   :  { %v533_v3 = vadd.f32 %v532_v61, %v531_v57  ;;  %v547_v4 = vadd.f32 %v546_v62, %v545_v58 }
 0x11c   :  { %v540_v5 = vadd.f32 %v539_v1, %v538_v63  ;;  %v554_v6 = vadd.f32 %v553_v2, %v552_v0 }
 0x11d   :  { %v534_v7 = vrot.slane %v533_v3, 2  ;;  %v548_v8 = vrot.slane %v547_v4, 2 }
 0x11e   :  { %v541_v9 = vrot.slane %v540_v5, 2  ;;  %v555_v10 = vrot.slane %v554_v6, 2 }
 0x11f   :  { %v535_v11 = vadd.f32 %v534_v7, %v533_v3  ;;  %v549_v12 = vadd.f32 %v548_v8, %v547_v4 }
 0x120   :  { %v542_v13 = vadd.f32 %v541_v9, %v540_v5  ;;  %v556_v14 = vadd.f32 %v555_v10, %v554_v6 }
 0x121   :  { %v536_v15 = vrot.slane %v535_v11, 1  ;;  %v550_v16 = vrot.slane %v549_v12, 1 }
 0x122   :  { %v543_v17 = vrot.slane %v542_v13, 1  ;;  %v557_v18 = vrot.slane %v556_v14, 1 }
 0x123   :  { %v537_v19 = vadd.f32 %v536_v15, %v535_v11  ;;  %v551_v20 = vadd.f32 %v550_v16, %v549_v12  ;;  %v616_v11 = vld [vmem:[%s1729_s3] sm:$0xf] }
 0x124   :  { %v544_v21 = vadd.f32 %v543_v17, %v542_v13  ;;  %v558_v22 = vadd.f32 %v557_v18, %v556_v14  ;;  %v642_v12 = vld [vmem:[%s1730_s4] sm:$0xf]  ;;  %v621_v13 = vrot.slane %v616_v11, %v1669_v38  ;;  %v629_v15 = vrot.slane %v616_v11, %v1671_v39 }
 0x125   :  { %v560_v23 = vmul.f32 0.5, %v537_v19  ;;  %v562_v24 = vmul.f32 0.5, %v551_v20  ;;  %v625_v18 = vrot.slane %v616_v11, %v1676_v41  ;;  %v647_v19 = vrot.slane %v642_v12, %v1669_v38 }
 0x126   :  { %v561_v25 = vmul.f32 0.5, %v544_v21  ;;  %v563_v26 = vmul.f32 0.5, %v558_v22  ;;  %v633_v22 = vrot.slane %v616_v11, %v1678_v42 }
 0x127   :  { %v564_v27 = vsub.f32 %v483_v49, %v560_v23  ;;  %v566_v28 = vsub.f32 %v524_v50, %v562_v24  ;;  %v655_v23 = vrot.slane %v642_v12, %v1671_v39 }
 0x128   :  { %v565_v29 = vsub.f32 %v485_v53, %v561_v25  ;;  %v1688_v30 = vsub.f32 %v526_v54, %v563_v26 }
 0x129   :  { %v568_v31 = vmul.f32 %v564_v27, %v564_v27  ;;  %v570_v32 = vmul.f32 %v566_v28, %v566_v28 }
 0x12a   :  { %v569_v33 = vmul.f32 %v565_v29, %v565_v29  ;;  %v571_v34 = vmul.f32 %v1688_v30, %v1688_v30 }
 0x12b   :  { %v572_v35 = vsel %vm530_vm0, %v568_v31, 0.0  ;;  %v586_v36 = vsel %vm530_vm0, %v570_v32, 0.0  ;;  %v651_v31 = vrot.slane %v642_v12, %v1676_v41 }
 0x12c   :  { %v573_v37 = vrot.slane %v572_v35, 4  ;;  %v587_v40 = vrot.slane %v586_v36, 4  ;;  %v579_v43 = vsel %vm530_vm0, %v569_v33, 0.0  ;;  %v593_v44 = vsel %vm530_vm0, %v571_v34, 0.0 }
 0x12d   :  { %v580_v45 = vrot.slane %v579_v43, 4  ;;  %v594_v46 = vrot.slane %v593_v44, 4 }
 0x12e   :  { %v574_v47 = vadd.f32 %v573_v37, %v572_v35  ;;  %v588_v48 = vadd.f32 %v587_v40, %v586_v36 }
 0x12f   :  { %v581_v49 = vadd.f32 %v580_v45, %v579_v43  ;;  %v595_v50 = vadd.f32 %v594_v46, %v593_v44 }
 0x130   :  { %v575_v51 = vrot.slane %v574_v47, 2  ;;  %v589_v52 = vrot.slane %v588_v48, 2 }
 0x131   :  { %v582_v53 = vrot.slane %v581_v49, 2  ;;  %v596_v54 = vrot.slane %v595_v50, 2 }
 0x132   :  { %v576_v55 = vadd.f32 %v575_v51, %v574_v47  ;;  %v590_v56 = vadd.f32 %v589_v52, %v588_v48  ;;  %v1099_v47 = vld [vmem:[%s1732_s6] ss:$0 sm:$0xff] }
 0x133   :  { %v583_v57 = vadd.f32 %v582_v53, %v581_v49  ;;  %v597_v58 = vadd.f32 %v596_v54, %v595_v50 }
 0x134   :  { %v577_v59 = vrot.slane %v576_v55, 1  ;;  %v591_v60 = vrot.slane %v590_v56, 1 }
 0x135   :  { %v584_v61 = vrot.slane %v583_v57, 1  ;;  %v598_v62 = vrot.slane %v597_v58, 1 }
 0x136   :  { %v578_v63 = vadd.f32 %v577_v59, %v576_v55  ;;  %v592_v0 = vadd.f32 %v591_v60, %v590_v56 }
 0x137   :  { %v585_v1 = vadd.f32 %v584_v61, %v583_v57  ;;  %v599_v2 = vadd.f32 %v598_v62, %v597_v58 }
 0x138   :  { %v600_v3 = vmul.f32 0.5, %v578_v63  ;;  %v602_v4 = vmul.f32 0.5, %v592_v0 }
 0x139   :  { %v601_v5 = vmul.f32 0.5, %v585_v1  ;;  %v603_v6 = vmul.f32 0.5, %v599_v2 }
 0x13a   :  { %v604_v7 = vadd.f32 1e-05, %v600_v3  ;;  %v606_v8 = vadd.f32 1e-05, %v602_v4 }
 0x13b   :  { %v605_v9 = vadd.f32 1e-05, %v601_v5  ;;  %v607_v10 = vadd.f32 1e-05, %v603_v6 }
 0x13c   :  { %1305 = vrsqrt.f32 %v604_v7 }
 0x13d   :  { %1307 = vrsqrt.f32 %v606_v8 }
 0x13e   :  { %1309 = vrsqrt.f32 %v605_v9 }
 0x13f   :  { %1311 = vrsqrt.f32 %v607_v10 }
 0x146   :  { %v1306_v14 = vpop.eup %1305 }
 0x147   :  { %v1308_v16 = vpop.eup %1307  ;;  %v612_v17 = vmul.f32 %v1306_v14, %v564_v27  ;;  %v659_v27 = vrot.slane %v642_v12, %v1678_v42 }
 0x148   :  { %v1310_v20 = vpop.eup %1309  ;;  %v614_v21 = vmul.f32 %v1308_v16, %v566_v28 }
 0x149   :  { %v1312_v24 = vpop.eup %1311  ;;  %v638_v25 = vmul.f32 %v621_v13, %v612_v17  ;;  %v613_v26 = vmul.f32 %v1310_v20, %v565_v29 }
 0x14a   :  { %v640_v32 = vmul.f32 %v629_v15, %v614_v21  ;;  %v615_v33 = vmul.f32 %v1312_v24, %v1688_v30 }
 0x14b   :  { %v639_v34 = vmul.f32 %v625_v18, %v613_v26  ;;  %v664_v35 = vadd.f32 %v647_v19, %v638_v25 }
 0x14c   :  { %v641_v36 = vmul.f32 %v633_v22, %v615_v33  ;;  %v666_v38 = vadd.f32 %v655_v23, %v640_v32 }
 0x14d   :  { %v665_v37 = vadd.f32 %v651_v31, %v639_v34  ;;  %v668_v40 = vmax.f32 %v664_v35, 0.0 }
 0x14e   :  { %v667_v28 = vadd.f32 %v659_v27, %v641_v36  ;;  %v670_v44 = vmax.f32 %v666_v38, 0.0 }
 0x14f   :  { %v669_v43 = vmax.f32 %v665_v37, 0.0  ;;  %v672_v29 = vpack.c.bf16 %v668_v40, %v668_v40 }
 0x150   :  { %v671_v39 = vmax.f32 %v667_v28, 0.0  ;;  %v674_v41 = vpack.c.bf16 %v670_v44, %v670_v44 }
 0x151   :  { %v673_v45 = vpack.c.bf16 %v669_v43, %v669_v43 }
 0x152   :  { %v675_v46 = vpack.c.bf16 %v671_v39, %v671_v39 }
 0x153   :  { %971 = vmatprep.mubr.bf16.mxu0 %v673_v45 }
 0x154   :  { %1011 = vmatprep.mubr.bf16.mxu1 %v675_v46  ;;  %972 = vmatmul.mubr.bf16.vlgmr.msra.gmra.mrb[4].mxu0 %v672_v29 }
 0x155   :  { %1012 = vmatmul.mubr.bf16.vlgmr.msra.gmra.mrb[4].mxu1 %v674_v41 }
 0x227   :  { %v1148_v30 = vpop.f32.mrb[4].mxu0 }
 0x228   :  { %v1170_v42 = vpop.f32.mrb[4].mxu1  ;;  %v1149_v48 = vpop.f32.mrb[5].mxu0 }
 0x229   :  { %v1150_v49 = vadd.f32 %v1149_v48, %v1148_v30  ;;  %v1171_v50 = vpop.f32.mrb[5].mxu1  ;;  %v1151_v51 = vpop.f32.mrb[6].mxu0 }
 0x22a   :  { %v1172_v52 = vadd.f32 %v1171_v50, %v1170_v42  ;;  %v1173_v53 = vpop.f32.mrb[6].mxu1  ;;  %v1152_v54 = vpop.f32.mrb[7].mxu0 }
 0x22b   :  { %v974_v55 = vadd.f32 %v1150_v49, %v1099_v47  ;;  %v1174_v56 = vpop.f32.mrb[7].mxu1 }
 0x22d   :  { %v1014_v57 = vadd.f32 %v1172_v52, %v974_v55 }
 0x22f   :  { %1019 = vst [vmem:[#allocation2] sm:$0x3] %v1014_v57 }
 0x230   :  { %1324 = shalt.err (!%p1321_p4)
}
 0x231   :  { %s1325_s12 = scalar_lea.hbm %s1733_s7, 32 }
 0x232   :  { %p1326_p5 = scmp.ne.s32.totalorder %s1733_s7, %s1325_s12  ;;  %p1329_p6 = scmp.lt.u32.totalorder %s1325_s12, %s1733_s7 }
 0x234   :  { %p1331_p7 = pnand %p1329_p6, %p1326_p5 }
 0x236   :  { %1334 = shalt.err (!%p1331_p7)
}
 0x237   :  { %1029 = dma.vmem_to_hbm [thread:$0]  %s1027_s9, 32, %s1733_s7, [#allocation3]  }
 0x238   :  { %1335 = dma.done.wait [#allocation3], 32  }
 0x239   :  { %1336 = vsyncadd [#allocation3], 4294967264 }
 0x23a   :  { %1033 = vsyncpa [#allocation3], 1 }

</bundles_post_ra>
